<compile_context>
chip_gen: v5e
topology: v5e:2x2
jax: 0.10.0
libtpu: 0.0.40
codegen_flags: <defaults>
</compile_context>

<pallas_src>
import jax
import jax.numpy as jnp
from jax.experimental import pallas as pl
from jax.experimental.pallas import tpu as pltpu

OUT_W = 128    # lane-dense packed output width
SLOT = 16      # per-head column slot inside the packed output
HID = 256      # hidden_dim of the heads (fixed 256 in the PyTorch module)
PROTO = 8      # prototype_embeddings_dim


def _round_up(n, m):
    return ((n + m - 1) // m) * m


# ----------------------------------------------------------------------------
# Pallas kernel: all three NER-style heads + assertion head, fully folded,
# fused over a row tile of the flattened (B*S, E) hidden states.
# ----------------------------------------------------------------------------
def _joint_heads_kernel(x_ref, w1_ref, b1_ref, wa_ref, ba_ref,
                        wo1_ref, wo2_ref, bo_ref, out_ref):
    x = x_ref[...]                                                  # (tn, E) bf16

    # stage 1: fused first Linear of all three heads -> (tn, 3H); ReLU in f32
    h = jnp.dot(x, w1_ref[...], preferred_element_type=jnp.float32) + b1_ref[...]
    h = jnp.maximum(h, 0.0)
    h_b = h.astype(jnp.bfloat16)

    # assertion pre-activation: folded (e_x = h_x@w2_x+b2_x ; cat ; @as_w1 + as_b1)
    a = jnp.dot(h_b, wa_ref[...], preferred_element_type=jnp.float32) + ba_ref[...]
    a = jnp.maximum(a, 0.0).astype(jnp.bfloat16)                    # (tn, H)

    # packed 128-lane output: [ner | det | neg | assertion | zero pad]
    out = (jnp.dot(h_b, wo1_ref[...], preferred_element_type=jnp.float32)
           + jnp.dot(a, wo2_ref[...], preferred_element_type=jnp.float32)
           + bo_ref[...])
    out_ref[...] = out


def joint_heads(x, packed, *, tn=256):
    """x: (N, E) float32.  packed: tuple of folded weights (see pack_weights)."""
    N, E = x.shape
    tn = min(tn, _round_up(N, 16))          # bf16 sublane tile is 16
    n_pad = _round_up(N, tn)                # don't silently drop trailing rows

    x = x.astype(jnp.bfloat16)
    if n_pad != N:
        x = jnp.pad(x, ((0, n_pad - N), (0, 0)))

    w1_p = packed[0]
    three_h = w1_p.shape[1]
    flops = 2 * n_pad * (E * three_h + three_h * HID + three_h * OUT_W + HID * OUT_W)
    bytes_accessed = (n_pad * E * 2 + n_pad * OUT_W * 4
                      + sum(int(w.size) * w.dtype.itemsize for w in packed))

    in_specs = [pl.BlockSpec((tn, E), lambda i: (i, 0))]
    in_specs += [pl.BlockSpec(w.shape, lambda i: (0, 0)) for w in packed]

    out = pl.pallas_call(
        _joint_heads_kernel,
        out_shape=jax.ShapeDtypeStruct((n_pad, OUT_W), jnp.float32),
        grid=(n_pad // tn,),
        in_specs=in_specs,
        out_specs=pl.BlockSpec((tn, OUT_W), lambda i: (i, 0)),
        compiler_params=pltpu.CompilerParams(
            dimension_semantics=("parallel",)),
        cost_estimate=pl.CostEstimate(
            flops=int(flops), transcendentals=0,
            bytes_accessed=int(bytes_accessed)),
    )(x, *packed)
    return out[:N]


# ----------------------------------------------------------------------------
# Weight folding / packing (done once, outside the kernel; exact algebra —
# biases folded too so logits match the unfolded reference).
# ----------------------------------------------------------------------------
def pack_weights(heads, assertion, num_tags):
    """heads: 3x (w1 (E,H), b1 (1,H), w2 (H,P), b2 (1,P), pw (P,c)) in f32.
       assertion: (as_w1 (3P,H), as_b1 (1,H), as_w2 (H,c_as), as_b2 (1,c_as))."""
    as_w1, as_b1, as_w2, as_b2 = assertion
    cs = list(num_tags[:3])
    c_as = num_tags[3]

    w1_p = jnp.concatenate([h[0] for h in heads], axis=1)           # (E, 3H)
    b1_p = jnp.concatenate([h[1] for h in heads], axis=1)           # (1, 3H)

    a_blocks = []
    ba = as_b1                                                      # (1, H)
    wo1 = jnp.zeros((3 * HID, OUT_W), jnp.float32)
    bo = jnp.zeros((1, OUT_W), jnp.float32)
    for i, (_, _, w2, b2, pw) in enumerate(heads):
        sl = as_w1[i * PROTO:(i + 1) * PROTO, :]                    # (P, H)
        a_blocks.append(w2 @ sl)                                    # (H, H)
        ba = ba + b2 @ sl
        wl = w2 @ pw                                                # (H, c_i)
        bl = b2 @ pw                                                # (1, c_i)
        col = i * SLOT
        wo1 = wo1.at[i * HID:(i + 1) * HID, col:col + cs[i]].set(wl)
        bo = bo.at[:, col:col + cs[i]].set(bl)
    wa = jnp.concatenate(a_blocks, axis=0)                          # (3H, H)

    wo2 = jnp.zeros((HID, OUT_W), jnp.float32)
    wo2 = wo2.at[:, 3 * SLOT:3 * SLOT + c_as].set(as_w2)
    bo = bo.at[:, 3 * SLOT:3 * SLOT + c_as].set(as_b2)

    return (w1_p.astype(jnp.bfloat16), b1_p,
            wa.astype(jnp.bfloat16), ba,
            wo1.astype(jnp.bfloat16), wo2.astype(jnp.bfloat16), bo)


# ----------------------------------------------------------------------------
# torchcrf-style Viterbi decode (plain JAX glue — tiny sequential recurrence
# over num_tags^2; returns padded tags + valid lengths instead of ragged lists)
# ----------------------------------------------------------------------------
def crf_decode(emissions, mask, start_trans, end_trans, trans):
    """emissions: (B, T, nt) f32, mask: (B, T) bool.
    TODO(synk): like torchcrf, requires mask[:, 0] to be True for every row
    (sequences of valid length 1 violate this after the [:, 1:] slice)."""
    B, T, nt = emissions.shape
    score0 = start_trans[None, :] + emissions[:, 0]                  # (B, nt)

    ems = jnp.swapaxes(emissions, 0, 1)[1:]                          # (T-1, B, nt)
    ms = jnp.swapaxes(mask, 0, 1)[1:]                                # (T-1, B)

    def fwd_step(score, inp):
        em, m = inp
        nxt = score[:, :, None] + trans[None, :, :] + em[:, None, :]  # (B,nt,nt)
        best = jnp.max(nxt, axis=1)
        idx = jnp.argmax(nxt, axis=1).astype(jnp.int32)
        new_score = jnp.where(m[:, None], best, score)
        return new_score, idx

    score, history = jax.lax.scan(fwd_step, score0, (ems, ms))       # (T-1,B,nt)
    score = score + end_trans[None, :]

    seq_ends = jnp.sum(mask.astype(jnp.int32), axis=1) - 1           # (B,)
    best_last = jnp.argmax(score, axis=1).astype(jnp.int32)          # (B,)

    hist_pad = jnp.concatenate(
        [history, jnp.zeros((1, B, nt), jnp.int32)], axis=0)         # (T, B, nt)
    ts = jnp.arange(T)

    def back_step(tag_above, inp):
        hist_t, t = inp
        from_hist = jnp.take_along_axis(hist_t, tag_above[:, None], axis=1)[:, 0]
        tag_t = jnp.where(t == seq_ends, best_last,
                          jnp.where(t < seq_ends, from_hist, 0)).astype(jnp.int32)
        return tag_t, tag_t

    _, tags = jax.lax.scan(back_step, jnp.zeros((B,), jnp.int32),
                           (hist_pad, ts), reverse=True)              # (T, B)
    return jnp.swapaxes(tags, 0, 1), seq_ends + 1                     # (B, T), (B,)


# ----------------------------------------------------------------------------
# Parameter construction + full forward
# ----------------------------------------------------------------------------
def make_raw_params(key, E, num_tags, vocab):
    c_ner, c_det, c_neg, c_as = num_tags
    ks = list(jax.random.split(key, 16))

    def nrm(k, shape, scale=0.05):
        return jax.random.normal(k, shape, jnp.float32) * scale

    def head_params(k, c):
        k1, k2, k3, k4, k5 = jax.random.split(k, 5)
        return (nrm(k1, (E, HID)),          # Linear(E, 256).weight.T
                nrm(k2, (1, HID)),
                nrm(k3, (HID, PROTO)),      # Linear(256, P).weight.T
                nrm(k4, (1, PROTO)),
                nrm(k5, (PROTO, c)))        # prottypes.weight  (P, num_classes)

    heads = [head_params(ks[0], c_ner),
             head_params(ks[1], c_det),
             head_params(ks[2], c_neg)]

    assertion = (nrm(ks[3], (3 * PROTO, HID)),   # Linear(3P, 256).weight.T
                 nrm(ks[4], (1, HID)),
                 nrm(ks[5], (HID, c_as)),        # Linear(256, c_as).weight.T
                 nrm(ks[6], (1, c_as)))

    def crf_params(k, c):
        k1, k2, k3 = jax.random.split(k, 3)
        u = lambda kk, s: jax.random.uniform(kk, s, jnp.float32, -0.1, 0.1)
        return (u(k1, (c,)), u(k2, (c,)), u(k3, (c, c)))

    ner_crf = crf_params(ks[7], c_ner)
    det_crf = crf_params(ks[8], c_det)
    emb_table = nrm(ks[9], (vocab, E), scale=0.1)   # BERT stand-in
    return emb_table, heads, assertion, ner_crf, det_crf


def crf_joint_forward(input_ids, attention_mask, attention_masks,
                      emb_table, packed, ner_crf, det_crf, num_tags, tn=256):
    B, S = input_ids.shape
    E = emb_table.shape[1]
    c_ner, c_det, c_neg, c_as = num_tags

    # base_model stand-in: deterministic embedding lookup -> last_hidden_state
    last_hidden = emb_table[input_ids]                               # (B, S, E)
    x = last_hidden.reshape(B * S, E).astype(jnp.float32)

    out = joint_heads(x, packed, tn=tn)                              # (B*S, 128)
    ner_logits = out[:, 0:c_ner].reshape(B, S, c_ner)
    det_logits = out[:, SLOT:SLOT + c_det].reshape(B, S, c_det)
    negex_outputs = out[:, 2 * SLOT:2 * SLOT + c_neg].reshape(B, S, c_neg)
    assertion_outputs = out[:, 3 * SLOT:3 * SLOT + c_as].reshape(B, S, c_as)

    ner_tags, ner_lens = crf_decode(ner_logits[:, 1:],
                                    attention_masks['ner'][:, 1:], *ner_crf)
    det_tags, det_lens = crf_decode(det_logits[:, 1:],
                                    attention_masks['detection'][:, 1:], *det_crf)

    return {
        'ner': (ner_tags, ner_lens),            # padded tags + valid lengths
        'detection': (det_tags, det_lens),
        'negex': negex_outputs,
        'assertion': assertion_outputs,
    }


# pure-JAX unfolded reference (f32) for numerical verification
def reference_heads(x, heads, assertion):
    as_w1, as_b1, as_w2, as_b2 = assertion
    es, logits = [], []
    for (w1, b1, w2, b2, pw) in heads:
        h = jnp.maximum(x @ w1 + b1, 0.0)
        e = h @ w2 + b2
        es.append(e)
        logits.append(e @ pw)
    cat = jnp.concatenate(es, axis=-1)
    a = jnp.maximum(cat @ as_w1 + as_b1, 0.0) @ as_w2 + as_b2
    return logits + [a]


if __name__ == "__main__":
    B, S, E = 2, 8, 128
    VOCAB = 100
    NUM_TAGS = (9, 3, 3, 4)   # ner, detection, negex, assertion

    key = jax.random.PRNGKey(0)
    k_par, k_ids = jax.random.split(key)
    emb_table, heads, assertion, ner_crf, det_crf = make_raw_params(
        k_par, E, NUM_TAGS, VOCAB)
    packed = pack_weights(heads, assertion, NUM_TAGS)

    input_ids = jax.random.randint(k_ids, (B, S), 0, VOCAB)
    attention_mask = jnp.ones((B, S), jnp.int32)
    lens = jnp.array([8, 6], jnp.int32)
    seq_mask = (jnp.arange(S)[None, :] < lens[:, None])              # (B, S) bool
    attention_masks = {'ner': seq_mask, 'detection': seq_mask}

    out = crf_joint_forward(input_ids, attention_mask, attention_masks,
                            emb_table, packed, ner_crf, det_crf, NUM_TAGS)
    out = jax.block_until_ready(out)

    # shape checks
    assert out['ner'][0].shape == (B, S - 1)
    assert out['detection'][0].shape == (B, S - 1)
    assert out['negex'].shape == (B, S, 3)
    assert out['assertion'].shape == (B, S, 4)

    # numerical check of the fused/folded kernel vs. the unfolded f32 reference
    x_flat = emb_table[input_ids].reshape(B * S, E).astype(jnp.float32)
    ref_ner, ref_det, ref_neg, ref_as = reference_heads(x_flat, heads, assertion)
    got = joint_heads(x_flat, packed)
    c_ner, c_det, c_neg, c_as = NUM_TAGS
    pairs = [(got[:, 0:c_ner], ref_ner),
             (got[:, SLOT:SLOT + c_det], ref_det),
             (got[:, 2 * SLOT:2 * SLOT + c_neg], ref_neg),
             (got[:, 3 * SLOT:3 * SLOT + c_as], ref_as)]
    for g, r in pairs:
        assert float(jnp.max(jnp.abs(g - r))) < 2e-2, "kernel/reference mismatch"

    print("KERNEL_OK")
</pallas_src>

<mosaic_0001>
module attributes {stable_mosaic.version = 11 : i64} {
  func.func @_joint_heads_kernel(%arg0: i32, %arg1: memref<16x128xbf16, #tpu.memory_space<vmem>>, %arg2: memref<128x768xbf16, #tpu.memory_space<vmem>>, %arg3: memref<1x768xf32, #tpu.memory_space<vmem>>, %arg4: memref<768x256xbf16, #tpu.memory_space<vmem>>, %arg5: memref<1x256xf32, #tpu.memory_space<vmem>>, %arg6: memref<768x128xbf16, #tpu.memory_space<vmem>>, %arg7: memref<256x128xbf16, #tpu.memory_space<vmem>>, %arg8: memref<1x128xf32, #tpu.memory_space<vmem>>, %arg9: memref<16x128xf32, #tpu.memory_space<vmem>>) attributes {dimension_semantics = [#tpu.dimension_semantics<parallel>], iteration_bounds = array<i64: 1>, scalar_prefetch = 0 : i64, scratch_operands = 0 : i64, tpu.core_type = #tpu.core_type<tc>, window_params = [{transform_indices = @transform_0, window_bounds = array<i64: 16, 128>}, {pipeline_mode = #tpu.pipeline_mode<synchronous>, transform_indices = @transform_1, window_bounds = array<i64: 128, 768>}, {pipeline_mode = #tpu.pipeline_mode<synchronous>, transform_indices = @transform_2, window_bounds = array<i64: 1, 768>}, {pipeline_mode = #tpu.pipeline_mode<synchronous>, transform_indices = @transform_3, window_bounds = array<i64: 768, 256>}, {pipeline_mode = #tpu.pipeline_mode<synchronous>, transform_indices = @transform_4, window_bounds = array<i64: 1, 256>}, {pipeline_mode = #tpu.pipeline_mode<synchronous>, transform_indices = @transform_5, window_bounds = array<i64: 768, 128>}, {pipeline_mode = #tpu.pipeline_mode<synchronous>, transform_indices = @transform_6, window_bounds = array<i64: 256, 128>}, {pipeline_mode = #tpu.pipeline_mode<synchronous>, transform_indices = @transform_7, window_bounds = array<i64: 1, 128>}, {transform_indices = @transform_8, window_bounds = array<i64: 16, 128>}]} {
    %c0 = arith.constant 0 : index
    %c0_0 = arith.constant 0 : index
    %0 = vector.load %arg1[%c0, %c0_0] : memref<16x128xbf16, #tpu.memory_space<vmem>>, vector<16x128xbf16>
    %c0_1 = arith.constant 0 : index
    %c0_2 = arith.constant 0 : index
    %1 = vector.load %arg2[%c0_1, %c0_2] : memref<128x768xbf16, #tpu.memory_space<vmem>>, vector<128x768xbf16>
    %cst = arith.constant dense<0.000000e+00> : vector<16x768xf32>
    %2 = tpu.matmul %0, %1, %cst {dimension_numbers = #tpu.dot_dimension_numbers<[1], [0], [0], [1], [0, 0, 1, 1], [], []>} : vector<16x128xbf16>, vector<128x768xbf16>, vector<16x768xf32> -> vector<16x768xf32>
    %c0_3 = arith.constant 0 : index
    %c0_4 = arith.constant 0 : index
    %3 = vector.load %arg3[%c0_3, %c0_4] : memref<1x768xf32, #tpu.memory_space<vmem>>, vector<1x768xf32>
    %4 = vector.broadcast %3 : vector<1x768xf32> to vector<16x768xf32>
    %5 = arith.addf %2, %4 : vector<16x768xf32>
    %cst_5 = arith.constant 0.000000e+00 : f32
    %6 = vector.broadcast %cst_5 : f32 to vector<16x768xf32>
    %7 = arith.maximumf %5, %6 : vector<16x768xf32>
    %8 = arith.truncf %7 : vector<16x768xf32> to vector<16x768xbf16>
    %c0_6 = arith.constant 0 : index
    %c0_7 = arith.constant 0 : index
    %9 = vector.load %arg4[%c0_6, %c0_7] : memref<768x256xbf16, #tpu.memory_space<vmem>>, vector<768x256xbf16>
    %cst_8 = arith.constant dense<0.000000e+00> : vector<16x256xf32>
    %10 = tpu.matmul %8, %9, %cst_8 {dimension_numbers = #tpu.dot_dimension_numbers<[1], [0], [0], [1], [0, 0, 1, 1], [], []>} : vector<16x768xbf16>, vector<768x256xbf16>, vector<16x256xf32> -> vector<16x256xf32>
    %c0_9 = arith.constant 0 : index
    %c0_10 = arith.constant 0 : index
    %11 = vector.load %arg5[%c0_9, %c0_10] : memref<1x256xf32, #tpu.memory_space<vmem>>, vector<1x256xf32>
    %12 = vector.broadcast %11 : vector<1x256xf32> to vector<16x256xf32>
    %13 = arith.addf %10, %12 : vector<16x256xf32>
    %cst_11 = arith.constant 0.000000e+00 : f32
    %14 = vector.broadcast %cst_11 : f32 to vector<16x256xf32>
    %15 = arith.maximumf %13, %14 : vector<16x256xf32>
    %16 = arith.truncf %15 : vector<16x256xf32> to vector<16x256xbf16>
    %c0_12 = arith.constant 0 : index
    %c0_13 = arith.constant 0 : index
    %17 = vector.load %arg6[%c0_12, %c0_13] : memref<768x128xbf16, #tpu.memory_space<vmem>>, vector<768x128xbf16>
    %cst_14 = arith.constant dense<0.000000e+00> : vector<16x128xf32>
    %18 = tpu.matmul %8, %17, %cst_14 {dimension_numbers = #tpu.dot_dimension_numbers<[1], [0], [0], [1], [0, 0, 1, 1], [], []>} : vector<16x768xbf16>, vector<768x128xbf16>, vector<16x128xf32> -> vector<16x128xf32>
    %c0_15 = arith.constant 0 : index
    %c0_16 = arith.constant 0 : index
    %19 = vector.load %arg7[%c0_15, %c0_16] : memref<256x128xbf16, #tpu.memory_space<vmem>>, vector<256x128xbf16>
    %cst_17 = arith.constant dense<0.000000e+00> : vector<16x128xf32>
    %20 = tpu.matmul %16, %19, %cst_17 {dimension_numbers = #tpu.dot_dimension_numbers<[1], [0], [0], [1], [0, 0, 1, 1], [], []>} : vector<16x256xbf16>, vector<256x128xbf16>, vector<16x128xf32> -> vector<16x128xf32>
    %21 = arith.addf %18, %20 : vector<16x128xf32>
    %c0_18 = arith.constant 0 : index
    %c0_19 = arith.constant 0 : index
    %22 = vector.load %arg8[%c0_18, %c0_19] : memref<1x128xf32, #tpu.memory_space<vmem>>, vector<1x128xf32>
    %23 = vector.broadcast %22 : vector<1x128xf32> to vector<16x128xf32>
    %24 = arith.addf %21, %23 : vector<16x128xf32>
    %c0_20 = arith.constant 0 : index
    %c0_21 = arith.constant 0 : index
    %25 = vector.load %arg9[%c0_20, %c0_21] : memref<16x128xf32, #tpu.memory_space<vmem>>, vector<16x128xf32>
    tpu.vector_store %arg9[%c0_20, %c0_21], %24 {strides = array<i32>} : memref<16x128xf32, #tpu.memory_space<vmem>>, vector<16x128xf32>,
    return
  }
  func.func @transform_0(%arg0: i32) -> (i32, i32) {
    %c0_i32 = arith.constant 0 : i32
    %c0_i32_0 = arith.constant 0 : i32
    return %arg0, %c0_i32 : i32, i32
  }
  func.func @transform_1(%arg0: i32) -> (i32, i32) {
    %c0_i32 = arith.constant 0 : i32
    %c0_i32_0 = arith.constant 0 : i32
    %c0_i32_1 = arith.constant 0 : i32
    return %c0_i32, %c0_i32_0 : i32, i32
  }
  func.func @transform_2(%arg0: i32) -> (i32, i32) {
    %c0_i32 = arith.constant 0 : i32
    %c0_i32_0 = arith.constant 0 : i32
    %c0_i32_1 = arith.constant 0 : i32
    return %c0_i32, %c0_i32_0 : i32, i32
  }
  func.func @transform_3(%arg0: i32) -> (i32, i32) {
    %c0_i32 = arith.constant 0 : i32
    %c0_i32_0 = arith.constant 0 : i32
    %c0_i32_1 = arith.constant 0 : i32
    return %c0_i32, %c0_i32_0 : i32, i32
  }
  func.func @transform_4(%arg0: i32) -> (i32, i32) {
    %c0_i32 = arith.constant 0 : i32
    %c0_i32_0 = arith.constant 0 : i32
    %c0_i32_1 = arith.constant 0 : i32
    return %c0_i32, %c0_i32_0 : i32, i32
  }
  func.func @transform_5(%arg0: i32) -> (i32, i32) {
    %c0_i32 = arith.constant 0 : i32
    %c0_i32_0 = arith.constant 0 : i32
    %c0_i32_1 = arith.constant 0 : i32
    return %c0_i32, %c0_i32_0 : i32, i32
  }
  func.func @transform_6(%arg0: i32) -> (i32, i32) {
    %c0_i32 = arith.constant 0 : i32
    %c0_i32_0 = arith.constant 0 : i32
    %c0_i32_1 = arith.constant 0 : i32
    return %c0_i32, %c0_i32_0 : i32, i32
  }
  func.func @transform_7(%arg0: i32) -> (i32, i32) {
    %c0_i32 = arith.constant 0 : i32
    %c0_i32_0 = arith.constant 0 : i32
    %c0_i32_1 = arith.constant 0 : i32
    return %c0_i32, %c0_i32_0 : i32, i32
  }
  func.func @transform_8(%arg0: i32) -> (i32, i32) {
    %c0_i32 = arith.constant 0 : i32
    %c0_i32_0 = arith.constant 0 : i32
    return %arg0, %c0_i32 : i32, i32
  }
}

</mosaic_0001>

<bundles_post_ra>
// kernel: tpu_custom_call.1
= control target key start
LH: loop header
LB: loop body
LE: loop exit
PB: predicated region body
PF: predicated region fallthrough
CT: control target
= control target key end

     0   :  { %13 = vsyncpa [#allocation3], 0  ;;  %s3322_s0 = inlined_call_operand.hbm [shape: bf16[16,128], index: 0, kind: input, shape index: {}]   ;;  %s3323_s1 = inlined_call_operand.hbm [shape: bf16[128,768], index: 1, kind: input, shape index: {}]   ;;  %s3324_s2 = inlined_call_operand.hbm [shape: f32[1,768], index: 2, kind: input, shape index: {}]   ;;  %s3325_s3 = inlined_call_operand.hbm [shape: bf16[768,256], index: 3, kind: input, shape index: {}]   ;;  %s3326_s4 = inlined_call_operand.vmem [shape: f32[1,256], index: 4, kind: input, shape index: {}]   ;;  %s3327_s5 = inlined_call_operand.hbm [shape: bf16[768,128], index: 5, kind: input, shape index: {}]   ;;  %s3328_s6 = inlined_call_operand.hbm [shape: bf16[256,128], index: 6, kind: input, shape index: {}]   ;;  %s3329_s7 = inlined_call_operand.vmem [shape: f32[1,128], index: 7, kind: input, shape index: {}]   ;;  %s3330_s8 = inlined_call_operand.hbm [shape: f32[16,128], index: 8, kind: output, shape index: {}]  }
   0x1   :  { %14 = vsyncpa [#allocation6], 0 }
   0x2   :  { %15 = vsyncpa [#allocation9], 0 }
   0x3   :  { %16 = vsyncpa [#allocation12], 0  ;;  %s35_s29 = sshll.u32 %s3323_s1, 4  ;;  %s36_s29 = int_to_ptr.hbm [resolvable:$true] %s35_s29 }
   0x4   :  { %17 = vsyncpa [#allocation4], 0  ;;  %s3181_s30 = smov [#allocation5]   ;;  %s59_s12 = sshll.u32 %s3325_s3, 4  ;;  %s60_s12 = int_to_ptr.hbm [resolvable:$true] %s59_s12 }
   0x5   :  { %s37_s9 = sshll.u32 %s3181_s30, 4  ;;  %s3182_s13 = smov 384   ;;  %s38_s9 = int_to_ptr.vmem [resolvable:$true] %s37_s9 }
   0x6   :  { %s3183_s14 = smov 24   ;;  %s3184_s15 = smov [#allocation8]  }
   0x7   :  { %43 = dma.hbm_to_vmem [thread:$0]  %s36_s29, 6144, %s38_s9, [#allocation6], %s3182_s13, %s3182_s13, %s3183_s14  }
   0x8   :  { %s61_s16 = sshll.u32 %s3184_s15, 4  ;;  %s3185_s17 = smov 128   ;;  %s62_s16 = int_to_ptr.vmem [resolvable:$true] %s61_s16 }
   0x9   :  { %s3186_s18 = smov 8   ;;  %s22_s20 = sshll.u32 %s3322_s0, 4  ;;  %s23_s20 = int_to_ptr.hbm [resolvable:$true] %s22_s20 }
   0xa   :  { %67 = dma.hbm_to_vmem [thread:$0]  %s60_s12, 12288, %s62_s16, [#allocation9], %s3185_s17, %s3185_s17, %s3186_s18  }
   0xb   :  { %s3187_s21 = smov [#allocation2]   ;;  %s49_s24 = sshll.u32 %s3324_s2, 4  ;;  %s50_s24 = int_to_ptr.hbm [resolvable:$true] %s49_s24 }
   0xc   :  { %s24_s3 = sshll.u32 %s3187_s21, 4  ;;  %s3188_s25 = smov 64   ;;  %s25_s3 = int_to_ptr.vmem [resolvable:$true] %s24_s3 }
   0xd   :  { %s3189_s26 = smov 4   ;;  %s3190_s27 = smov [#allocation7]  }
   0xe   :  { %30 = dma.hbm_to_vmem [thread:$0]  %s23_s20, 128, %s25_s3, [#allocation3], %s3188_s25, %s3188_s25, %s3189_s26  }
   0xf   :  { %s51_s28 = sshll.u32 %s3190_s27, 4  ;;  %s74_s9 = sshll.u32 %s3327_s5, 4  ;;  %s52_s28 = int_to_ptr.vmem [resolvable:$true] %s51_s28  ;;  %s75_s9 = int_to_ptr.hbm [resolvable:$true] %s74_s9 }
  0x10   :  { %54 = dma.hbm_to_vmem [thread:$0]  %s50_s24, 96, %s52_s28, [#allocation6]  }
  0x11   :  { %s87_s11 = sshll.u32 %s3328_s6, 4  ;;  %s3191_s12 = smov [#allocation10]   ;;  %s88_s11 = int_to_ptr.hbm [resolvable:$true] %s87_s11 }
  0x12   :  { %s76_s13 = sshll.u32 %s3191_s12, 4  ;;  %s3192_s2 = smov [#allocation11]   ;;  %s77_s13 = int_to_ptr.vmem [resolvable:$true] %s76_s13 }
  0x13   :  { %82 = dma.hbm_to_vmem [thread:$0]  %s75_s9, 6144, %s77_s13, [#allocation9], %s3188_s25, %s3188_s25, %s3189_s26  }
  0x14   :  { %s89_s14 = sshll.u32 %s3192_s2, 4  ;;  %s90_s14 = int_to_ptr.vmem [resolvable:$true] %s89_s14 }
  0x15   :  { %95 = dma.hbm_to_vmem [thread:$0]  %s88_s11, 2048, %s90_s14, [#allocation12], %s3188_s25, %s3188_s25, %s3189_s26  }
  0x16   :  { %3171 = dma.done.wait [#allocation3], 128  }
  0x17   :  { %3172 = vsyncadd [#allocation3], 4294967168 }
  0x18   :  { %3173 = dma.done.wait [#allocation6], 6240  }
  0x19   :  { %3174 = vsyncadd [#allocation6], 4294961056 }
  0x1a   :  { %3175 = dma.done.wait [#allocation9], 18432  }
  0x1b   :  { %3176 = vsyncadd [#allocation9], 4294948864 }
  0x1c   :  { %3177 = dma.done.wait [#allocation12], 2048  }
  0x1d   :  { %3178 = vsyncadd [#allocation12], 4294965248  ;;  %v2118_v0 = vld [vmem:[#allocation5 + $0x150] sm:$0xf]  ;;  %v2826_v1 = vld [vmem:[#allocation5 + $0x164] sm:$0xf0] }
  0x1e   :  { %v2823_v2 = vld [vmem:[#allocation5 + $0x154] sm:$0xf]  ;;  %v2119_v3 = vor.u32 %v2826_v1, %v2118_v0  ;;  %v2120_v4 = vld [vmem:[#allocation5 + $0x168] sm:$0xf0]  ;;  %v2126_v5 = vld [vmem:[#allocation5 + $0x158] sm:$0xf] }
  0x1f   :  { %v2827_v6 = vld [vmem:[#allocation5 + $0x16c] sm:$0xf0]  ;;  %v2123_v7 = vor.u32 %v2823_v2, %v2120_v4  ;;  %v2824_v9 = vld [vmem:[#allocation5 + $0x15c] sm:$0xf]  ;;  %v2128_v10 = vld [vmem:[#allocation5 + $0x170] sm:$0xf0] }
  0x20   :  { %v2127_v8 = vor.u32 %v2827_v6, %v2126_v5  ;;  %v2094_v11 = vld [vmem:[#allocation5 + $0x120] sm:$0xf]  ;;  %432 = vmatpush.bf16.msra.mxu0 %v2119_v3  ;;  %v2131_v12 = vor.u32 %v2824_v9, %v2128_v10  ;;  %v2820_v13 = vld [vmem:[#allocation5 + $0x134] sm:$0xf0]  ;;  %v2817_v14 = vld [vmem:[#allocation5 + $0x124] sm:$0xf] }
  0x21   :  { %v2096_v15 = vld [vmem:[#allocation5 + $0x138] sm:$0xf0]  ;;  %446 = vmatpush.bf16.msra.mxu1 %v2123_v7  ;;  %v2095_v16 = vor.u32 %v2820_v13, %v2094_v11  ;;  %v2102_v18 = vld [vmem:[#allocation5 + $0x128] sm:$0xf]  ;;  %v2821_v19 = vld [vmem:[#allocation5 + $0x13c] sm:$0xf0] }
  0x22   :  { %460 = vmatpush.bf16.msra.mxu2 %v2127_v8  ;;  %v2099_v17 = vor.u32 %v2817_v14, %v2096_v15  ;;  %v2818_v20 = vld [vmem:[#allocation5 + $0x12c] sm:$0xf]  ;;  %474 = vmatpush.bf16.msra.mxu3 %v2131_v12  ;;  %v2103_v21 = vor.u32 %v2821_v19, %v2102_v18  ;;  %v2104_v22 = vld [vmem:[#allocation5 + $0x140] sm:$0xf0]  ;;  %v2070_v23 = vld [vmem:[#allocation5 + $0xf0] sm:$0xf] }
  0x23   :  { %v2814_v24 = vld [vmem:[#allocation5 + $0x104] sm:$0xf0]  ;;  %v2107_v25 = vor.u32 %v2818_v20, %v2104_v22  ;;  %v2811_v26 = vld [vmem:[#allocation5 + $0xf4] sm:$0xf]  ;;  %v2072_v27 = vld [vmem:[#allocation5 + $0x108] sm:$0xf0] }
  0x24   :  { %v2078_v28 = vld [vmem:[#allocation5 + $0xf8] sm:$0xf]  ;;  %433 = vmatpush.bf16.msra.mxu0 %v2095_v16  ;;  %v2071_v29 = vor.u32 %v2814_v24, %v2070_v23  ;;  %v2815_v30 = vld [vmem:[#allocation5 + $0x10c] sm:$0xf0]  ;;  %v2812_v31 = vld [vmem:[#allocation5 + $0xfc] sm:$0xf]  ;;  %v2075_v33 = vor.u32 %v2811_v26, %v2072_v27 }
  0x25   :  { %v2080_v32 = vld [vmem:[#allocation5 + $0x110] sm:$0xf0]  ;;  %447 = vmatpush.bf16.msra.mxu1 %v2099_v17  ;;  %v2079_v34 = vor.u32 %v2815_v30, %v2078_v28  ;;  %v2046_v35 = vld [vmem:[#allocation5 + $0xc0] sm:$0xf]  ;;  %v2808_v36 = vld [vmem:[#allocation5 + $0xd4] sm:$0xf0] }
  0x26   :  { %461 = vmatpush.bf16.msra.mxu2 %v2103_v21  ;;  %v2805_v37 = vld [vmem:[#allocation5 + $0xc4] sm:$0xf]  ;;  %475 = vmatpush.bf16.msra.mxu3 %v2107_v25  ;;  %v2083_v38 = vor.u32 %v2812_v31, %v2080_v32  ;;  %v2048_v39 = vld [vmem:[#allocation5 + $0xd8] sm:$0xf0]  ;;  %v2054_v40 = vld [vmem:[#allocation5 + $0xc8] sm:$0xf]  ;;  %v2047_v44 = vor.u32 %v2808_v36, %v2046_v35 }
  0x27   :  { %v2809_v41 = vld [vmem:[#allocation5 + $0xdc] sm:$0xf0]  ;;  %v2806_v42 = vld [vmem:[#allocation5 + $0xcc] sm:$0xf]  ;;  %v2056_v43 = vld [vmem:[#allocation5 + $0xe0] sm:$0xf0]  ;;  %v2051_v45 = vor.u32 %v2805_v37, %v2048_v39 }
  0x28   :  { %434 = vmatpush.bf16.msra.mxu0 %v2071_v29  ;;  %v2055_v46 = vor.u32 %v2809_v41, %v2054_v40  ;;  %v2022_v47 = vld [vmem:[#allocation5 + $0x90] sm:$0xf]  ;;  %v2802_v48 = vld [vmem:[#allocation5 + $0xa4] sm:$0xf0]  ;;  %v2799_v49 = vld [vmem:[#allocation5 + $0x94] sm:$0xf]  ;;  %v2059_v50 = vor.u32 %v2806_v42, %v2056_v43 }
  0x29   :  { %448 = vmatpush.bf16.msra.mxu1 %v2075_v33  ;;  %v2024_v51 = vld [vmem:[#allocation5 + $0xa8] sm:$0xf0]  ;;  %v2030_v52 = vld [vmem:[#allocation5 + $0x98] sm:$0xf]  ;;  %v2803_v53 = vld [vmem:[#allocation5 + $0xac] sm:$0xf0]  ;;  %v2023_v56 = vor.u32 %v2802_v48, %v2022_v47 }
  0x2a   :  { %462 = vmatpush.bf16.msra.mxu2 %v2079_v34  ;;  %476 = vmatpush.bf16.msra.mxu3 %v2083_v38  ;;  %v2800_v54 = vld [vmem:[#allocation5 + $0x9c] sm:$0xf]  ;;  %v2032_v55 = vld [vmem:[#allocation5 + $0xb0] sm:$0xf0]  ;;  %v2027_v57 = vor.u32 %v2799_v49, %v2024_v51  ;;  %v2031_v58 = vor.u32 %v2803_v53, %v2030_v52  ;;  %v1998_v59 = vld [vmem:[#allocation5 + $0x60] sm:$0xf] }
  0x2b   :  { %v2796_v60 = vld [vmem:[#allocation5 + $0x74] sm:$0xf0]  ;;  %v2793_v61 = vld [vmem:[#allocation5 + $0x64] sm:$0xf]  ;;  %v2035_v62 = vor.u32 %v2800_v54, %v2032_v55  ;;  %v2000_v63 = vld [vmem:[#allocation5 + $0x78] sm:$0xf0] }
  0x2c   :  { %435 = vmatpush.bf16.msra.mxu0 %v2047_v44  ;;  %v2006_v0 = vld [vmem:[#allocation5 + $0x68] sm:$0xf]  ;;  %v2797_v1 = vld [vmem:[#allocation5 + $0x7c] sm:$0xf0]  ;;  %v2794_v2 = vld [vmem:[#allocation5 + $0x6c] sm:$0xf]  ;;  %v1999_v4 = vor.u32 %v2796_v60, %v1998_v59  ;;  %v2003_v5 = vor.u32 %v2793_v61, %v2000_v63 }
  0x2d   :  { %449 = vmatpush.bf16.msra.mxu1 %v2051_v45  ;;  %v2008_v3 = vld [vmem:[#allocation5 + $0x80] sm:$0xf0]  ;;  %v2007_v6 = vor.u32 %v2797_v1, %v2006_v0  ;;  %v1974_v7 = vld [vmem:[#allocation5 + $0x30] sm:$0xf]  ;;  %v2790_v8 = vld [vmem:[#allocation5 + $0x44] sm:$0xf0] }
  0x2e   :  { %463 = vmatpush.bf16.msra.mxu2 %v2055_v46  ;;  %477 = vmatpush.bf16.msra.mxu3 %v2059_v50  ;;  %v2787_v9 = vld [vmem:[#allocation5 + $0x34] sm:$0xf]  ;;  %v2011_v10 = vor.u32 %v2794_v2, %v2008_v3  ;;  %v1976_v11 = vld [vmem:[#allocation5 + $0x48] sm:$0xf0]  ;;  %v1982_v12 = vld [vmem:[#allocation5 + $0x38] sm:$0xf]  ;;  %v1975_v16 = vor.u32 %v2790_v8, %v1974_v7 }
  0x2f   :  { %v2791_v13 = vld [vmem:[#allocation5 + $0x4c] sm:$0xf0]  ;;  %v2788_v14 = vld [vmem:[#allocation5 + $0x3c] sm:$0xf]  ;;  %v1984_v15 = vld [vmem:[#allocation5 + $0x50] sm:$0xf0]  ;;  %v1979_v18 = vor.u32 %v2787_v9, %v1976_v11 }
  0x30   :  { %436 = vmatpush.bf16.msra.mxu0 %v2023_v56  ;;  %v1950_v17 = vld [vmem:[#allocation5] sm:$0xf]  ;;  %v1983_v19 = vor.u32 %v2791_v13, %v1982_v12  ;;  %v2784_v20 = vld [vmem:[#allocation5 + $0x14] sm:$0xf0]  ;;  %v2781_v21 = vld [vmem:[#allocation5 + $0x4] sm:$0xf]  ;;  %v1987_v23 = vor.u32 %v2788_v14, %v1984_v15 }
  0x31   :  { %450 = vmatpush.bf16.msra.mxu1 %v2027_v57  ;;  %v1952_v22 = vld [vmem:[#allocation5 + $0x18] sm:$0xf0]  ;;  %v1958_v24 = vld [vmem:[#allocation5 + $0x8] sm:$0xf]  ;;  %v2785_v25 = vld [vmem:[#allocation5 + $0x1c] sm:$0xf0]  ;;  %v1951_v30 = vor.u32 %v2784_v20, %v1950_v17 }
  0x32   :  { %464 = vmatpush.bf16.msra.mxu2 %v2031_v58  ;;  %478 = vmatpush.bf16.msra.mxu3 %v2035_v62  ;;  %v2782_v26 = vld [vmem:[#allocation5 + $0xc] sm:$0xf]  ;;  %v1960_v27 = vld [vmem:[#allocation5 + $0x20] sm:$0xf0]  ;;  %v2134_v28 = vld [vmem:[#allocation5 + $0x160] sm:$0xf]  ;;  %v1955_v33 = vor.u32 %v2781_v21, %v1952_v22  ;;  %v1959_v34 = vor.u32 %v2785_v25, %v1958_v24 }
  0x33   :  { %v2828_v29 = vld [vmem:[#allocation5 + $0x174] sm:$0xf0]  ;;  %v2825_v31 = vld [vmem:[#allocation5 + $0x164] sm:$0xf]  ;;  %v2136_v32 = vld [vmem:[#allocation5 + $0x178] sm:$0xf0]  ;;  %v1963_v35 = vor.u32 %v2782_v26, %v1960_v27 }
  0x34   :  { %437 = vmatpush.bf16.msra.mxu0 %v1999_v4  ;;  %v2135_v36 = vor.u32 %v2828_v29, %v2134_v28  ;;  %v2139_v37 = vor.u32 %v2825_v31, %v2136_v32  ;;  %v3260_v38 = vld [vmem:[#allocation2] sm:$0xff]  ;;  %v2110_v39 = vld [vmem:[#allocation5 + $0x130] sm:$0xf]  ;;  %v2822_v40 = vld [vmem:[#allocation5 + $0x144] sm:$0xf0]  ;;  %s3193_s16 = smov [#allocation13]  }
  0x35   :  { %451 = vmatpush.bf16.msra.mxu1 %v2003_v5  ;;  %v2819_v41 = vld [vmem:[#allocation5 + $0x134] sm:$0xf]  ;;  %v2112_v42 = vld [vmem:[#allocation5 + $0x148] sm:$0xf0]  ;;  %v2111_v43 = vor.u32 %v2822_v40, %v2110_v39  ;;  %v2086_v45 = vld [vmem:[#allocation5 + $0x100] sm:$0xf] }
  0x36   :  { %465 = vmatpush.bf16.msra.mxu2 %v2007_v6  ;;  %479 = vmatpush.bf16.msra.mxu3 %v2011_v10  ;;  %v2115_v44 = vor.u32 %v2819_v41, %v2112_v42  ;;  %v2816_v46 = vld [vmem:[#allocation5 + $0x114] sm:$0xf0]  ;;  %v2813_v47 = vld [vmem:[#allocation5 + $0x104] sm:$0xf]  ;;  %v2088_v48 = vld [vmem:[#allocation5 + $0x118] sm:$0xf0] }
  0x37   :  { %v2198_v49 = vld [vmem:[#allocation8 + $0x70] sm:$0xf]  ;;  %v2844_v50 = vld [vmem:[#allocation8 + $0x74] sm:$0xf0]  ;;  %v2087_v53 = vor.u32 %v2816_v46, %v2086_v45  ;;  %v2062_v54 = vld [vmem:[#allocation5 + $0xd0] sm:$0xf]  ;;  %v2091_v57 = vor.u32 %v2813_v47, %v2088_v48 }
  0x38   :  { %438 = vmatpush.bf16.msra.mxu0 %v1975_v16  ;;  %v2262_v51 = vld [vmem:[#allocation8 + $0xf0] sm:$0xf]  ;;  %v2860_v52 = vld [vmem:[#allocation8 + $0xf4] sm:$0xf0]  ;;  %v2199_v55 = vor.u32 %v2844_v50, %v2198_v49  ;;  %v2810_v58 = vld [vmem:[#allocation5 + $0xe4] sm:$0xf0] }
  0x39   :  { %452 = vmatpush.bf16.msra.mxu1 %v1979_v18  ;;  %v2263_v56 = vor.u32 %v2860_v52, %v2262_v51  ;;  %v2807_v59 = vld [vmem:[#allocation5 + $0xd4] sm:$0xf]  ;;  %v2064_v60 = vld [vmem:[#allocation5 + $0xe8] sm:$0xf0]  ;;  %v2190_v61 = vld [vmem:[#allocation8 + $0x60] sm:$0xf]  ;;  %v2063_v2 = vor.u32 %v2810_v58, %v2062_v54 }
  0x3a   :  { %466 = vmatpush.bf16.msra.mxu2 %v1983_v19  ;;  %480 = vmatpush.bf16.msra.mxu3 %v1987_v23  ;;  %v2842_v62 = vld [vmem:[#allocation8 + $0x64] sm:$0xf0]  ;;  %v2254_v63 = vld [vmem:[#allocation8 + $0xe0] sm:$0xf]  ;;  %v2038_v3 = vld [vmem:[#allocation5 + $0xa0] sm:$0xf]  ;;  %v2067_v5 = vor.u32 %v2807_v59, %v2064_v60 }
  0x3b   :  { %v2191_v0 = vor.u32 %v2842_v62, %v2190_v61  ;;  %v2858_v1 = vld [vmem:[#allocation8 + $0xe4] sm:$0xf0]  ;;  %v2804_v6 = vld [vmem:[#allocation5 + $0xb4] sm:$0xf0]  ;;  %v2801_v7 = vld [vmem:[#allocation5 + $0xa4] sm:$0xf] }
  0x3c   :  { %439 = vmatpush.bf16.msra.mxu0 %v1951_v30  ;;  %v2255_v4 = vor.u32 %v2858_v1, %v2254_v63  ;;  %v2040_v8 = vld [vmem:[#allocation5 + $0xb8] sm:$0xf0]  ;;  %v2182_v9 = vld [vmem:[#allocation8 + $0x50] sm:$0xf]  ;;  %v2039_v14 = vor.u32 %v2804_v6, %v2038_v3  ;;  %v2014_v15 = vld [vmem:[#allocation5 + $0x70] sm:$0xf] }
  0x3d   :  { %453 = vmatpush.bf16.msra.mxu1 %v1955_v33  ;;  %v2840_v10 = vld [vmem:[#allocation8 + $0x54] sm:$0xf0]  ;;  %v2246_v11 = vld [vmem:[#allocation8 + $0xd0] sm:$0xf]  ;;  %v2043_v17 = vor.u32 %v2801_v7, %v2040_v8  ;;  %v2798_v18 = vld [vmem:[#allocation5 + $0x84] sm:$0xf0] }
  0x3e   :  { %467 = vmatpush.bf16.msra.mxu2 %v1959_v34  ;;  %481 = vmatpush.bf16.msra.mxu3 %v1963_v35  ;;  %v2183_v12 = vor.u32 %v2840_v10, %v2182_v9  ;;  %v2856_v13 = vld [vmem:[#allocation8 + $0xd4] sm:$0xf0]  ;;  %v2795_v19 = vld [vmem:[#allocation5 + $0x74] sm:$0xf]  ;;  %v2016_v20 = vld [vmem:[#allocation5 + $0x88] sm:$0xf0]  ;;  %v2015_v26 = vor.u32 %v2798_v18, %v2014_v15 }
  0x3f   :  { %440 = vmatmul.bf16.vlgmr.msra.gmra.mxu0 %v3260_v38  ;;  %v2247_v16 = vor.u32 %v2856_v13, %v2246_v11  ;;  %v2174_v21 = vld [vmem:[#allocation8 + $0x40] sm:$0xf]  ;;  %v2838_v22 = vld [vmem:[#allocation8 + $0x44] sm:$0xf0]  ;;  %v1990_v27 = vld [vmem:[#allocation5 + $0x40] sm:$0xf]  ;;  %v2019_v29 = vor.u32 %v2795_v19, %v2016_v20 }
  0x40   :  { %488 = vmatpush.bf16.msrb.mxu0 %v2135_v36  ;;  %454 = vmatmul.bf16.vlgmr.msra.gmra.mxu1 %v3260_v38  ;;  %v2238_v23 = vld [vmem:[#allocation8 + $0xc0] sm:$0xf]  ;;  %v2175_v24 = vor.u32 %v2838_v22, %v2174_v21  ;;  %v2854_v25 = vld [vmem:[#allocation8 + $0xc4] sm:$0xf0]  ;;  %v2792_v30 = vld [vmem:[#allocation5 + $0x54] sm:$0xf0] }
  0x41   :  { %502 = vmatpush.bf16.msrb.mxu1 %v2139_v37  ;;  %468 = vmatmul.bf16.vlgmr.msra.gmra.mxu2 %v3260_v38  ;;  %v2239_v28 = vor.u32 %v2854_v25, %v2238_v23  ;;  %v2789_v31 = vld [vmem:[#allocation5 + $0x44] sm:$0xf]  ;;  %v1992_v32 = vld [vmem:[#allocation5 + $0x58] sm:$0xf0]  ;;  %v2166_v33 = vld [vmem:[#allocation8 + $0x30] sm:$0xf]  ;;  %v1991_v39 = vor.u32 %v2792_v30, %v1990_v27 }
  0x42   :  { %482 = vmatmul.bf16.vlgmr.msra.gmra.mxu3 %v3260_v38  ;;  %1116 = vmatpush.bf16.msrb.mxu2 %v2199_v55  ;;  %v2836_v34 = vld [vmem:[#allocation8 + $0x34] sm:$0xf0]  ;;  %v2230_v35 = vld [vmem:[#allocation8 + $0xb0] sm:$0xf]  ;;  %v1966_v40 = vld [vmem:[#allocation5 + $0x10] sm:$0xf] }
  0x43   :  { %1130 = vmatpush.bf16.msrb.mxu3 %v2263_v56  ;;  %v2167_v36 = vor.u32 %v2836_v34, %v2166_v33  ;;  %v2852_v37 = vld [vmem:[#allocation8 + $0xb4] sm:$0xf0]  ;;  %v2786_v41 = vld [vmem:[#allocation5 + $0x24] sm:$0xf0]  ;;  %v2783_v42 = vld [vmem:[#allocation5 + $0x14] sm:$0xf] }
  0x44   :  { %489 = vmatpush.bf16.msrb.mxu0 %v2111_v43  ;;  %v2231_v43 = vor.u32 %v2852_v37, %v2230_v35  ;;  %v1968_v45 = vld [vmem:[#allocation5 + $0x28] sm:$0xf0]  ;;  %v2326_v46 = vld [vmem:[#allocation8 + $0x170] sm:$0xf]  ;;  %v2876_v47 = vld [vmem:[#allocation8 + $0x174] sm:$0xf0]  ;;  %v1967_v55 = vor.u32 %v2786_v41, %v1966_v40 }
  0x45   :  { %503 = vmatpush.bf16.msrb.mxu1 %v2115_v44  ;;  %v1995_v44 = vor.u32 %v2789_v31, %v1992_v32  ;;  %v2158_v48 = vld [vmem:[#allocation8 + $0x20] sm:$0xf]  ;;  %v2834_v49 = vld [vmem:[#allocation8 + $0x24] sm:$0xf0]  ;;  %v2390_v51 = vld [vmem:[#allocation8 + $0x1f0] sm:$0xf]  ;;  %v2327_v58 = vor.u32 %v2876_v47, %v2326_v46 }
  0x46   :  { %1117 = vmatpush.bf16.msrb.mxu2 %v2191_v0  ;;  %v2222_v50 = vld [vmem:[#allocation8 + $0xa0] sm:$0xf]  ;;  %v2892_v52 = vld [vmem:[#allocation8 + $0x1f4] sm:$0xf0]  ;;  %v2850_v54 = vld [vmem:[#allocation8 + $0xa4] sm:$0xf0] }
  0x47   :  { %1131 = vmatpush.bf16.msrb.mxu3 %v2255_v4  ;;  %v2223_v56 = vor.u32 %v2850_v54, %v2222_v50  ;;  %v2391_v59 = vor.u32 %v2892_v52, %v2390_v51  ;;  %v2318_v60 = vld [vmem:[#allocation8 + $0x160] sm:$0xf]  ;;  %v2874_v61 = vld [vmem:[#allocation8 + $0x164] sm:$0xf0]  ;;  %v2150_v0 = vld [vmem:[#allocation8 + $0x10] sm:$0xf] }
  0x48   :  { %490 = vmatpush.bf16.msrb.mxu0 %v2087_v53  ;;  %v2159_v53 = vor.u32 %v2834_v49, %v2158_v48  ;;  %v2382_v62 = vld [vmem:[#allocation8 + $0x1e0] sm:$0xf]  ;;  %v2890_v63 = vld [vmem:[#allocation8 + $0x1e4] sm:$0xf0]  ;;  %v2832_v1 = vld [vmem:[#allocation8 + $0x14] sm:$0xf0] }
  0x49   :  { %504 = vmatpush.bf16.msrb.mxu1 %v2091_v57  ;;  %v1971_v57 = vor.u32 %v2783_v42, %v1968_v45  ;;  %v2214_v3 = vld [vmem:[#allocation8 + $0x90] sm:$0xf]  ;;  %v2848_v4 = vld [vmem:[#allocation8 + $0x94] sm:$0xf0]  ;;  %v2383_v8 = vor.u32 %v2890_v63, %v2382_v62  ;;  %v2830_v13 = vld [vmem:[#allocation8 + $0x4] sm:$0xf0] }
  0x4a   :  { %1118 = vmatpush.bf16.msrb.mxu2 %v2183_v12  ;;  %v2310_v6 = vld [vmem:[#allocation8 + $0x150] sm:$0xf]  ;;  %v2215_v7 = vor.u32 %v2848_v4, %v2214_v3  ;;  %v2872_v9 = vld [vmem:[#allocation8 + $0x154] sm:$0xf0]  ;;  %v2142_v12 = vld [vmem:[#allocation8] sm:$0xf] }
  0x4b   :  { %1132 = vmatpush.bf16.msrb.mxu3 %v2247_v16  ;;  %v2374_v10 = vld [vmem:[#allocation8 + $0x1d0] sm:$0xf]  ;;  %v2888_v11 = vld [vmem:[#allocation8 + $0x1d4] sm:$0xf0]  ;;  %v2143_v15 = vor.u32 %v2830_v13, %v2142_v12  ;;  %v2846_v16 = vld [vmem:[#allocation8 + $0x84] sm:$0xf0] }
  0x4c   :  { %491 = vmatpush.bf16.msrb.mxu0 %v2063_v2  ;;  %v2151_v2 = vor.u32 %v2832_v1, %v2150_v0  ;;  %v2375_v19 = vor.u32 %v2888_v11, %v2374_v10  ;;  %v2302_v20 = vld [vmem:[#allocation8 + $0x140] sm:$0xf]  ;;  %v2870_v21 = vld [vmem:[#allocation8 + $0x144] sm:$0xf0]  ;;  %v2868_v27 = vld [vmem:[#allocation8 + $0x134] sm:$0xf0] }
  0x4d   :  { %505 = vmatpush.bf16.msrb.mxu1 %v2067_v5  ;;  %v2319_v5 = vor.u32 %v2874_v61, %v2318_v60  ;;  %v2366_v22 = vld [vmem:[#allocation8 + $0x1c0] sm:$0xf]  ;;  %v2886_v23 = vld [vmem:[#allocation8 + $0x1c4] sm:$0xf0]  ;;  %v2278_v37 = vld [vmem:[#allocation8 + $0x110] sm:$0xf] }
  0x4e   :  { %1119 = vmatpush.bf16.msrb.mxu2 %v2175_v24  ;;  %v2303_v24 = vor.u32 %v2870_v21, %v2302_v20  ;;  %v2367_v25 = vor.u32 %v2886_v23, %v2366_v22  ;;  %v2286_v31 = vld [vmem:[#allocation8 + $0x120] sm:$0xf]  ;;  %v2866_v32 = vld [vmem:[#allocation8 + $0x124] sm:$0xf0]  ;;  %v2342_v40 = vld [vmem:[#allocation8 + $0x190] sm:$0xf] }
  0x4f   :  { %1133 = vmatpush.bf16.msrb.mxu3 %v2239_v28  ;;  %v2884_v28 = vld [vmem:[#allocation8 + $0x1b4] sm:$0xf0]  ;;  %v2350_v33 = vld [vmem:[#allocation8 + $0x1a0] sm:$0xf]  ;;  %v2882_v34 = vld [vmem:[#allocation8 + $0x1a4] sm:$0xf0]  ;;  %v2287_v35 = vor.u32 %v2866_v32, %v2286_v31 }
  0x50   :  { %492 = vmatpush.bf16.msrb.mxu0 %v2039_v14  ;;  %v2206_v14 = vld [vmem:[#allocation8 + $0x80] sm:$0xf]  ;;  %v2880_v41 = vld [vmem:[#allocation8 + $0x194] sm:$0xf0]  ;;  %v2862_v45 = vld [vmem:[#allocation8 + $0x104] sm:$0xf0] }
  0x51   :  { %506 = vmatpush.bf16.msrb.mxu1 %v2043_v17  ;;  %v2311_v17 = vor.u32 %v2872_v9, %v2310_v6  ;;  %v2207_v18 = vor.u32 %v2846_v16, %v2206_v14  ;;  %v2334_v46 = vld [vmem:[#allocation8 + $0x180] sm:$0xf]  ;;  %v2878_v47 = vld [vmem:[#allocation8 + $0x184] sm:$0xf0]  ;;  %v2843_v48 = vld [vmem:[#allocation8 + $0x74] sm:$0xf] }
  0x52   :  { %1120 = vmatpush.bf16.msrb.mxu2 %v2167_v36  ;;  %v2351_v36 = vor.u32 %v2882_v34, %v2350_v33  ;;  %v2200_v49 = vld [vmem:[#allocation8 + $0x78] sm:$0xf0]  ;;  %v2859_v50 = vld [vmem:[#allocation8 + $0xf4] sm:$0xf]  ;;  %v2454_v62 = vld [vmem:[#allocation8 + $0x270] sm:$0xf] }
  0x53   :  { %1134 = vmatpush.bf16.msrb.mxu3 %v2231_v43  ;;  %v2343_v43 = vor.u32 %v2880_v41, %v2342_v40  ;;  %v2264_v51 = vld [vmem:[#allocation8 + $0xf8] sm:$0xf0]  ;;  %v2203_v54 = vor.u32 %v2843_v48, %v2200_v49  ;;  %v2908_v63 = vld [vmem:[#allocation8 + $0x274] sm:$0xf0]  ;;  %v2518_v0 = vld [vmem:[#allocation8 + $0x2f0] sm:$0xf] }
  0x54   :  { %493 = vmatpush.bf16.msrb.mxu0 %v2015_v26  ;;  %v2294_v26 = vld [vmem:[#allocation8 + $0x130] sm:$0xf]  ;;  %v2455_v1 = vor.u32 %v2908_v63, %v2454_v62  ;;  %v2839_v3 = vld [vmem:[#allocation8 + $0x54] sm:$0xf]  ;;  %v2184_v4 = vld [vmem:[#allocation8 + $0x58] sm:$0xf0] }
  0x55   :  { %507 = vmatpush.bf16.msrb.mxu1 %v2019_v29  ;;  %v2295_v29 = vor.u32 %v2868_v27, %v2294_v26  ;;  %v2187_v6 = vor.u32 %v2839_v3, %v2184_v4  ;;  %v2446_v10 = vld [vmem:[#allocation8 + $0x260] sm:$0xf]  ;;  %v2906_v11 = vld [vmem:[#allocation8 + $0x264] sm:$0xf0]  ;;  %v2438_v22 = vld [vmem:[#allocation8 + $0x250] sm:$0xf] }
  0x56   :  { %1121 = vmatpush.bf16.msrb.mxu2 %v2159_v53  ;;  %v2335_v53 = vor.u32 %v2878_v47, %v2334_v46  ;;  %v2447_v12 = vor.u32 %v2906_v11, %v2446_v10  ;;  %v2510_v13 = vld [vmem:[#allocation8 + $0x2e0] sm:$0xf]  ;;  %v2922_v14 = vld [vmem:[#allocation8 + $0x2e4] sm:$0xf0]  ;;  %v2904_v23 = vld [vmem:[#allocation8 + $0x254] sm:$0xf0] }
  0x57   :  { %1135 = vmatpush.bf16.msrb.mxu3 %v2223_v56  ;;  %v2841_v56 = vld [vmem:[#allocation8 + $0x64] sm:$0xf]  ;;  %v2511_v16 = vor.u32 %v2922_v14, %v2510_v13  ;;  %v2920_v26 = vld [vmem:[#allocation8 + $0x2d4] sm:$0xf0]  ;;  %v2835_v27 = vld [vmem:[#allocation8 + $0x34] sm:$0xf] }
  0x58   :  { %494 = vmatpush.bf16.msrb.mxu0 %v1991_v39  ;;  %v2864_v39 = vld [vmem:[#allocation8 + $0x114] sm:$0xf0]  ;;  %v2232_v31 = vld [vmem:[#allocation8 + $0xb8] sm:$0xf0]  ;;  %v2430_v33 = vld [vmem:[#allocation8 + $0x240] sm:$0xf] }
  0x59   :  { %508 = vmatpush.bf16.msrb.mxu1 %v1995_v44  ;;  %v2279_v42 = vor.u32 %v2864_v39, %v2278_v37  ;;  %v2270_v44 = vld [vmem:[#allocation8 + $0x100] sm:$0xf]  ;;  %v2902_v34 = vld [vmem:[#allocation8 + $0x244] sm:$0xf0]  ;;  %v2833_v39 = vld [vmem:[#allocation8 + $0x24] sm:$0xf] }
  0x5a   :  { %1122 = vmatpush.bf16.msrb.mxu2 %v2151_v2  ;;  %v2271_v52 = vor.u32 %v2862_v45, %v2270_v44  ;;  %v2924_v2 = vld [vmem:[#allocation8 + $0x2f4] sm:$0xf0]  ;;  %v2918_v37 = vld [vmem:[#allocation8 + $0x2c4] sm:$0xf0]  ;;  %v2160_v40 = vld [vmem:[#allocation8 + $0x28] sm:$0xf0] }
  0x5b   :  { %1136 = vmatpush.bf16.msrb.mxu3 %v2215_v7  ;;  %v2855_v7 = vld [vmem:[#allocation8 + $0xd4] sm:$0xf]  ;;  %v2224_v44 = vld [vmem:[#allocation8 + $0xa8] sm:$0xf0]  ;;  %v2422_v46 = vld [vmem:[#allocation8 + $0x230] sm:$0xf] }
  0x5c   :  { %495 = vmatpush.bf16.msrb.mxu0 %v1967_v55  ;;  %v2267_v55 = vor.u32 %v2859_v50, %v2264_v51  ;;  %v2900_v47 = vld [vmem:[#allocation8 + $0x234] sm:$0xf0]  ;;  %v2486_v48 = vld [vmem:[#allocation8 + $0x2b0] sm:$0xf]  ;;  %v2831_v51 = vld [vmem:[#allocation8 + $0x14] sm:$0xf] }
  0x5d   :  { %509 = vmatpush.bf16.msrb.mxu1 %v1971_v57  ;;  %v2192_v57 = vld [vmem:[#allocation8 + $0x68] sm:$0xf0]  ;;  %v2423_v49 = vor.u32 %v2900_v47, %v2422_v46  ;;  %v2916_v50 = vld [vmem:[#allocation8 + $0x2b4] sm:$0xf0]  ;;  %v2914_v62 = vld [vmem:[#allocation8 + $0x2a4] sm:$0xf0] }
  0x5e   :  { %1123 = vmatpush.bf16.msrb.mxu2 %v2143_v15  ;;  %v2195_v60 = vor.u32 %v2841_v56, %v2192_v57  ;;  %v2837_v15 = vld [vmem:[#allocation8 + $0x44] sm:$0xf]  ;;  %v2216_v56 = vld [vmem:[#allocation8 + $0x98] sm:$0xf0]  ;;  %v2208_v4 = vld [vmem:[#allocation8 + $0x88] sm:$0xf0] }
  0x5f   :  { %496 = vmatmul.bf16.vlgmr.msrb.gmra.mxu0 %v3260_v38  ;;  %1137 = vmatpush.bf16.msrb.mxu3 %v2207_v18  ;;  %v2853_v18 = vld [vmem:[#allocation8 + $0xc4] sm:$0xf]  ;;  %v2912_v10 = vld [vmem:[#allocation8 + $0x294] sm:$0xf0]  ;;  %v2894_v13 = vld [vmem:[#allocation8 + $0x204] sm:$0xf0] }
  0x60   :  { %1144 = vmatpush.bf16.msra.mxu0 %v2327_v58  ;;  %510 = vmatmul.bf16.vlgmr.msrb.gmra.mxu1 %v3260_v38  ;;  %v2358_v38 = vld [vmem:[#allocation8 + $0x1b0] sm:$0xf]  ;;  %v2857_v58 = vld [vmem:[#allocation8 + $0xe4] sm:$0xf]  ;;  %v2462_v14 = vld [vmem:[#allocation8 + $0x280] sm:$0xf] }
  0x61   :  { %1158 = vmatpush.bf16.msra.mxu1 %v2391_v59  ;;  %v2359_v30 = vor.u32 %v2884_v28, %v2358_v38  ;;  %v2256_v59 = vld [vmem:[#allocation8 + $0xe8] sm:$0xf0]  ;;  %v2168_v38 = vld [vmem:[#allocation8 + $0x38] sm:$0xf0]  ;;  %v2829_v63 = vld [vmem:[#allocation8 + $0x4] sm:$0xf] }
  0x62   :  { %v2259_v61 = vor.u32 %v2857_v58, %v2256_v59  ;;  %1172 = vmatpush.bf16.msra.mxu2 %v2455_v1  ;;  %v2414_v58 = vld [vmem:[#allocation8 + $0x220] sm:$0xf]  ;;  %v2898_v59 = vld [vmem:[#allocation8 + $0x224] sm:$0xf0]  ;;  %v2845_v3 = vld [vmem:[#allocation8 + $0x84] sm:$0xf] }
  0x63   :  { %v2873_v46 = vld [vmem:[#allocation8 + $0x164] sm:$0xf]  ;;  %v2320_v47 = vld [vmem:[#allocation8 + $0x168] sm:$0xf0]  ;;  %s1926_s1 = sshll.u32 %s3193_s16, 4  ;;  %s1928_s21 = sshll.u32 %s3330_s8, 4  ;;  %s1927_s1 = int_to_ptr.vmem [resolvable:$true] %s1926_s1  ;;  %s1929_s21 = int_to_ptr.hbm [resolvable:$true] %s1928_s21 }
  0x64   :  { %1145 = vmatpush.bf16.msra.mxu0 %v2319_v5  ;;  %v2519_v5 = vor.u32 %v2924_v2, %v2518_v0  ;;  %v2144_v0 = vld [vmem:[#allocation8 + $0x8] sm:$0xf0] }
  0x65   :  { %1159 = vmatpush.bf16.msra.mxu1 %v2383_v8  ;;  %v2248_v8 = vld [vmem:[#allocation8 + $0xd8] sm:$0xf0]  ;;  %v2147_v2 = vor.u32 %v2829_v63, %v2144_v0  ;;  %v2871_v63 = vld [vmem:[#allocation8 + $0x154] sm:$0xf] }
  0x66   :  { %v2251_v9 = vor.u32 %v2855_v7, %v2248_v8  ;;  %1186 = vmatpush.bf16.msra.mxu3 %v2519_v5  ;;  %1173 = vmatpush.bf16.msra.mxu2 %v2447_v12  ;;  %v2211_v5 = vor.u32 %v2845_v3, %v2208_v4  ;;  %v2896_v7 = vld [vmem:[#allocation8 + $0x214] sm:$0xf0]  ;;  %v2470_v8 = vld [vmem:[#allocation8 + $0x290] sm:$0xf]  ;;  %v2398_v12 = vld [vmem:[#allocation8 + $0x200] sm:$0xf] }
  0x67   :  { %v2471_v11 = vor.u32 %v2912_v10, %v2470_v8  ;;  %v2312_v0 = vld [vmem:[#allocation8 + $0x158] sm:$0xf0]  ;;  %v2905_v8 = vld [vmem:[#allocation8 + $0x264] sm:$0xf] }
  0x68   :  { %1146 = vmatpush.bf16.msra.mxu0 %v2311_v17  ;;  %v2176_v17 = vld [vmem:[#allocation8 + $0x48] sm:$0xf0]  ;;  %v2376_v3 = vld [vmem:[#allocation8 + $0x1d8] sm:$0xf0]  ;;  %v2921_v10 = vld [vmem:[#allocation8 + $0x2e4] sm:$0xf] }
  0x69   :  { %1160 = vmatpush.bf16.msra.mxu1 %v2375_v19  ;;  %v2240_v19 = vld [vmem:[#allocation8 + $0xc8] sm:$0xf0]  ;;  %v2179_v20 = vor.u32 %v2837_v15, %v2176_v17  ;;  %v2399_v15 = vor.u32 %v2894_v13, %v2398_v12  ;;  %v3268_v17 = vld [vmem:[#allocation7] sm:$0x3f] }
  0x6a   :  { %v2243_v21 = vor.u32 %v2853_v18, %v2240_v19  ;;  %1187 = vmatpush.bf16.msra.mxu3 %v2511_v16  ;;  %v2910_v16 = vld [vmem:[#allocation8 + $0x284] sm:$0xf0]  ;;  %v2512_v13 = vld [vmem:[#allocation8 + $0x2e8] sm:$0xf0] }
  0x6b   :  { %v2463_v18 = vor.u32 %v2910_v16, %v2462_v14  ;;  %v2304_v16 = vld [vmem:[#allocation8 + $0x148] sm:$0xf0] }
  0x6c   :  { %1147 = vmatpush.bf16.msra.mxu0 %v2303_v24  ;;  %v2502_v24 = vld [vmem:[#allocation8 + $0x2d0] sm:$0xf] }
  0x6d   :  { %1161 = vmatpush.bf16.msra.mxu1 %v2367_v25  ;;  %v2439_v25 = vor.u32 %v2904_v23, %v2438_v22  ;;  %v2503_v28 = vor.u32 %v2920_v26, %v2502_v24  ;;  %v175_v22 = vperm.slane %v3268_v17, 1  ;;  %v176_v26 = vperm.slane %v3268_v17, 2 }
  0x6f   :  { %1174 = vmatpush.bf16.msra.mxu2 %v2439_v25  ;;  %1188 = vmatpush.bf16.msra.mxu3 %v2503_v28 }
  0x70   :  { %1148 = vmatpush.bf16.msra.mxu0 %v2295_v29  ;;  %v2171_v29 = vor.u32 %v2835_v27, %v2168_v38 }
  0x71   :  { %1162 = vmatpush.bf16.msra.mxu1 %v2359_v30  ;;  %v2851_v30 = vld [vmem:[#allocation8 + $0xb4] sm:$0xf] }
  0x72   :  { %v2235_v32 = vor.u32 %v2851_v30, %v2232_v31 }
  0x74   :  { %1149 = vmatpush.bf16.msra.mxu0 %v2287_v35  ;;  %v2494_v35 = vld [vmem:[#allocation8 + $0x2c0] sm:$0xf] }
  0x75   :  { %1163 = vmatpush.bf16.msra.mxu1 %v2351_v36  ;;  %v2431_v36 = vor.u32 %v2902_v34, %v2430_v33  ;;  %v2495_v41 = vor.u32 %v2918_v37, %v2494_v35  ;;  %v2328_v33 = vld [vmem:[#allocation8 + $0x178] sm:$0xf0] }
  0x76   :  { %v2392_v37 = vld [vmem:[#allocation8 + $0x1f8] sm:$0xf0] }
  0x77   :  { %1175 = vmatpush.bf16.msra.mxu2 %v2431_v36  ;;  %1189 = vmatpush.bf16.msra.mxu3 %v2495_v41  ;;  %v2891_v36 = vld [vmem:[#allocation8 + $0x1f4] sm:$0xf] }
  0x78   :  { %1150 = vmatpush.bf16.msra.mxu0 %v2279_v42  ;;  %v2163_v42 = vor.u32 %v2833_v39, %v2160_v40 }
  0x79   :  { %1164 = vmatpush.bf16.msra.mxu1 %v2343_v43  ;;  %v2849_v43 = vld [vmem:[#allocation8 + $0xa4] sm:$0xf] }
  0x7a   :  { %v2227_v45 = vor.u32 %v2849_v43, %v2224_v44 }
  0x7b   :  { %1176 = vmatpush.bf16.msra.mxu2 %v2423_v49  ;;  %v2889_v49 = vld [vmem:[#allocation8 + $0x1e4] sm:$0xf] }
  0x7c   :  { %1151 = vmatpush.bf16.msra.mxu0 %v2271_v52  ;;  %v2152_v52 = vld [vmem:[#allocation8 + $0x18] sm:$0xf0] }
  0x7d   :  { %1165 = vmatpush.bf16.msra.mxu1 %v2335_v53  ;;  %v2487_v53 = vor.u32 %v2916_v50, %v2486_v48  ;;  %v2384_v50 = vld [vmem:[#allocation8 + $0x1e8] sm:$0xf0] }
  0x7f   :  { %1190 = vmatpush.bf16.msra.mxu3 %v2487_v53  ;;  %v2456_v53 = vld [vmem:[#allocation8 + $0x278] sm:$0xf0] }
  0x80   :  { %1200 = vmatpush.bf16.msrb.mxu0 %v2203_v54  ;;  %v2155_v54 = vor.u32 %v2831_v51, %v2152_v52  ;;  %v2907_v52 = vld [vmem:[#allocation8 + $0x274] sm:$0xf] }
  0x81   :  { %1214 = vmatpush.bf16.msrb.mxu1 %v2267_v55  ;;  %v2847_v55 = vld [vmem:[#allocation8 + $0x94] sm:$0xf] }
  0x82   :  { %v2219_v57 = vor.u32 %v2847_v55, %v2216_v56 }
  0x84   :  { %1201 = vmatpush.bf16.msrb.mxu0 %v2195_v60  ;;  %v2478_v60 = vld [vmem:[#allocation8 + $0x2a0] sm:$0xf] }
  0x85   :  { %1215 = vmatpush.bf16.msrb.mxu1 %v2259_v61  ;;  %v2415_v61 = vor.u32 %v2898_v59, %v2414_v58  ;;  %v2479_v1 = vor.u32 %v2914_v62, %v2478_v60  ;;  %v2520_v58 = vld [vmem:[#allocation8 + $0x2f8] sm:$0xf0]  ;;  %v2323_v59 = vor.u32 %v2873_v46, %v2320_v47  ;;  %v2387_v62 = vor.u32 %v2889_v49, %v2384_v50 }
  0x86   :  { %v178_v46 = vperm.slane %v3268_v17, 4 }
  0x87   :  { %1177 = vmatpush.bf16.msra.mxu2 %v2415_v61  ;;  %1191 = vmatpush.bf16.msra.mxu3 %v2479_v1 }
  0x88   :  { %1202 = vmatpush.bf16.msrb.mxu0 %v2187_v6  ;;  %v2406_v6 = vld [vmem:[#allocation8 + $0x210] sm:$0xf] }
  0x89   :  { %1216 = vmatpush.bf16.msrb.mxu1 %v2251_v9  ;;  %v2407_v9 = vor.u32 %v2896_v7, %v2406_v6 }
  0x8b   :  { %1178 = vmatpush.bf16.msra.mxu2 %v2407_v9  ;;  %1192 = vmatpush.bf16.msra.mxu3 %v2471_v11  ;;  %v2448_v9 = vld [vmem:[#allocation8 + $0x268] sm:$0xf0]  ;;  %v2315_v11 = vor.u32 %v2871_v63, %v2312_v0  ;;  %v2897_v0 = vld [vmem:[#allocation8 + $0x224] sm:$0xf] }
  0x8c   :  { %1203 = vmatpush.bf16.msrb.mxu0 %v2179_v20  ;;  %v174_v20 = vperm.slane %v3268_v17, 0 }
  0x8d   :  { %1217 = vmatpush.bf16.msrb.mxu1 %v2243_v21 }
  0x8f   :  { %1179 = vmatpush.bf16.msra.mxu2 %v2399_v15  ;;  %1193 = vmatpush.bf16.msra.mxu3 %v2463_v18  ;;  %v2869_v15 = vld [vmem:[#allocation8 + $0x144] sm:$0xf] }
  0x90   :  { %1204 = vmatpush.bf16.msrb.mxu0 %v2171_v29  ;;  %v177_v29 = vperm.slane %v3268_v17, 3  ;;  %v2885_v18 = vld [vmem:[#allocation8 + $0x1c4] sm:$0xf] }
  0x91   :  { %1218 = vmatpush.bf16.msrb.mxu1 %v2235_v32  ;;  %v2875_v32 = vld [vmem:[#allocation8 + $0x174] sm:$0xf] }
  0x94   :  { %1205 = vmatpush.bf16.msrb.mxu0 %v2163_v42  ;;  %v2331_v42 = vor.u32 %v2875_v32, %v2328_v33  ;;  %v2901_v33 = vld [vmem:[#allocation8 + $0x244] sm:$0xf] }
  0x95   :  { %1219 = vmatpush.bf16.msrb.mxu1 %v2227_v45  ;;  %v2395_v45 = vor.u32 %v2891_v36, %v2392_v37  ;;  %v2496_v37 = vld [vmem:[#allocation8 + $0x2c8] sm:$0xf0] }
  0x98   :  { %1206 = vmatpush.bf16.msrb.mxu0 %v2155_v54 }
  0x99   :  { %1220 = vmatpush.bf16.msrb.mxu1 %v2219_v57  ;;  %v2923_v57 = vld [vmem:[#allocation8 + $0x2f4] sm:$0xf] }
  0x9a   :  { %v2523_v7 = vor.u32 %v2923_v57, %v2520_v58  ;;  %v2863_v57 = vld [vmem:[#allocation8 + $0x114] sm:$0xf]  ;;  %v2280_v58 = vld [vmem:[#allocation8 + $0x118] sm:$0xf0] }
  0x9c   :  { %1207 = vmatpush.bf16.msrb.mxu0 %v2147_v2  ;;  %v2887_v2 = vld [vmem:[#allocation8 + $0x1d4] sm:$0xf] }
  0x9d   :  { %1221 = vmatpush.bf16.msrb.mxu1 %v2211_v5  ;;  %v2459_v5 = vor.u32 %v2907_v52, %v2456_v53  ;;  %v2379_v14 = vor.u32 %v2887_v2, %v2376_v3  ;;  %v2424_v52 = vld [vmem:[#allocation8 + $0x238] sm:$0xf0]  ;;  %v2915_v53 = vld [vmem:[#allocation8 + $0x2b4] sm:$0xf]  ;;  %v2913_v2 = vld [vmem:[#allocation8 + $0x2a4] sm:$0xf]  ;;  %v2283_v3 = vor.u32 %v2863_v57, %v2280_v58 }
  0x9e   :  { %v2933_v57 = vld [vmem:[#allocation10 + $0x40] sm:$0xff]  ;;  %v2964_v58 = vld [vmem:[#allocation10 + $0x138] sm:$0xff] }
  0xbc   :  { %v441_v19 = vpop.f32.mrf.mxu0 }
  0xbd   :  { %v455_v21 = vpop.f32.mrf.mxu1  ;;  %v442_v23 = vadd.f32 %v441_v19, %v174_v20  ;;  %v2368_v19 = vld [vmem:[#allocation8 + $0x1c8] sm:$0xf0] }
  0xbe   :  { %v456_v24 = vadd.f32 %v455_v21, %v175_v22  ;;  %v2515_v21 = vor.u32 %v2921_v10, %v2512_v13  ;;  %v2336_v13 = vld [vmem:[#allocation8 + $0x188] sm:$0xf0] }
  0xbf   :  { %v516_v28 = vmax.f32 %v442_v23, 0.0  ;;  %v2440_v23 = vld [vmem:[#allocation8 + $0x258] sm:$0xf0] }
  0xc0   :  { %v517_v34 = vmax.f32 %v456_v24, 0.0  ;;  %v2919_v24 = vld [vmem:[#allocation8 + $0x2d4] sm:$0xf] }
  0xc4   :  { %v469_v25 = vpop.f32.mrf.mxu2  ;;  %v443_v38 = vpop.f32.mrf.mxu0 }
  0xc5   :  { %v483_v27 = vpop.f32.mrf.mxu3  ;;  %v444_v30 = vadd.f32 %v443_v38, %v174_v20  ;;  %v457_v31 = vpop.f32.mrf.mxu1  ;;  %v470_v40 = vadd.f32 %v469_v25, %v176_v26  ;;  %v2451_v20 = vor.u32 %v2905_v8, %v2448_v9  ;;  %v2307_v25 = vor.u32 %v2869_v15, %v2304_v16  ;;  %v2867_v38 = vld [vmem:[#allocation8 + $0x134] sm:$0xf]  ;;  %v2861_v8 = vld [vmem:[#allocation8 + $0x104] sm:$0xf]  ;;  %v2272_v9 = vld [vmem:[#allocation8 + $0x108] sm:$0xf0] }
  0xc6   :  { %v458_v35 = vadd.f32 %v457_v31, %v175_v22  ;;  %v484_v43 = vadd.f32 %v483_v27, %v177_v29  ;;  %v2903_v22 = vld [vmem:[#allocation8 + $0x254] sm:$0xf]  ;;  %v2371_v27 = vor.u32 %v2885_v18, %v2368_v19 }
  0xc7   :  { %v522_v39 = vmax.f32 %v444_v30, 0.0  ;;  %v518_v54 = vmax.f32 %v470_v40, 0.0  ;;  %v2360_v30 = vld [vmem:[#allocation8 + $0x1b8] sm:$0xf0]  ;;  %v2443_v31 = vor.u32 %v2903_v22, %v2440_v23  ;;  %v2865_v40 = vld [vmem:[#allocation8 + $0x124] sm:$0xf]  ;;  %v2275_v22 = vor.u32 %v2861_v8, %v2272_v9 }
  0xc8   :  { %v523_v41 = vmax.f32 %v458_v35, 0.0  ;;  %v519_v60 = vmax.f32 %v484_v43, 0.0  ;;  %v2917_v35 = vld [vmem:[#allocation8 + $0x2c4] sm:$0xf]  ;;  %v2980_v9 = vld [vmem:[#allocation11 + $0x38] sm:$0xff] }
  0xc9   :  { %v3274_v44 = vpack.c.bf16 %v522_v39, %v516_v28  ;;  %v2296_v28 = vld [vmem:[#allocation8 + $0x138] sm:$0xf0]  ;;  %v2881_v43 = vld [vmem:[#allocation8 + $0x1a4] sm:$0xf]  ;;  %v2499_v50 = vor.u32 %v2917_v35, %v2496_v37 }
  0xca   :  { %v3276_v48 = vpack.c.bf16 %v523_v41, %v517_v34  ;;  %v2432_v34 = vld [vmem:[#allocation8 + $0x248] sm:$0xf0]  ;;  %v2299_v36 = vor.u32 %v2867_v38, %v2296_v28  ;;  %v2909_v35 = vld [vmem:[#allocation8 + $0x284] sm:$0xf] }
  0xcb   :  { %1124 = vmatmul.bf16.vlgmr.msrb.gmra.mxu2 %v3274_v44  ;;  %v2288_v41 = vld [vmem:[#allocation8 + $0x128] sm:$0xf0]  ;;  %v2435_v49 = vor.u32 %v2901_v33, %v2432_v34  ;;  %v2893_v33 = vld [vmem:[#allocation8 + $0x204] sm:$0xf] }
  0xcc   :  { %v471_v51 = vpop.f32.mrf.mxu2  ;;  %1138 = vmatmul.bf16.vlgmr.msrb.gmra.mxu3 %v3276_v48  ;;  %1228 = vmatpush.bf16.msrb.mxu2 %v2331_v42  ;;  %v2400_v34 = vld [vmem:[#allocation8 + $0x208] sm:$0xf0]  ;;  %v2965_v8 = vld [vmem:[#allocation10 + $0x140] sm:$0xff] }
  0xcd   :  { %v472_v55 = vadd.f32 %v471_v51, %v176_v26  ;;  %v485_v56 = vpop.f32.mrf.mxu3  ;;  %1242 = vmatpush.bf16.msrb.mxu3 %v2395_v45  ;;  %v2504_v26 = vld [vmem:[#allocation8 + $0x2d8] sm:$0xf0]  ;;  %v2352_v45 = vld [vmem:[#allocation8 + $0x1a8] sm:$0xf0]  ;;  %v2899_v51 = vld [vmem:[#allocation8 + $0x234] sm:$0xf]  ;;  %v2403_v37 = vor.u32 %v2893_v33, %v2400_v34 }
  0xce   :  { %v486_v61 = vadd.f32 %v485_v56, %v177_v29  ;;  %v2883_v29 = vld [vmem:[#allocation8 + $0x1b4] sm:$0xf]  ;;  %v2507_v32 = vor.u32 %v2919_v24, %v2504_v26  ;;  %v2355_v56 = vor.u32 %v2881_v43, %v2352_v45  ;;  %v2472_v26 = vld [vmem:[#allocation8 + $0x298] sm:$0xf0]  ;;  %v2930_v45 = vld [vmem:[#allocation10 + $0x28] sm:$0xff] }
  0xcf   :  { %v524_v1 = vmax.f32 %v472_v55, 0.0  ;;  %v2363_v39 = vor.u32 %v2883_v29, %v2360_v30  ;;  %v2488_v55 = vld [vmem:[#allocation8 + $0x2b8] sm:$0xf0]  ;;  %v2939_v43 = vld [vmem:[#allocation10 + $0x70] sm:$0xff] }
  0xd0   :  { %v525_v4 = vmax.f32 %v486_v61, 0.0  ;;  %1229 = vmatpush.bf16.msrb.mxu2 %v2323_v59  ;;  %v179_v59 = vperm.slane %v3268_v17, 5  ;;  %v2344_v61 = vld [vmem:[#allocation8 + $0x198] sm:$0xf0]  ;;  %v2491_v63 = vor.u32 %v2915_v53, %v2488_v55  ;;  %v2877_v17 = vld [vmem:[#allocation8 + $0x184] sm:$0xf] }
  0xd1   :  { %v3280_v6 = vpack.c.bf16 %v524_v1, %v518_v54  ;;  %1243 = vmatpush.bf16.msrb.mxu3 %v2387_v62  ;;  %v2291_v54 = vor.u32 %v2865_v40, %v2288_v41  ;;  %v2427_v62 = vor.u32 %v2899_v51, %v2424_v52  ;;  %v2416_v1 = vld [vmem:[#allocation8 + $0x228] sm:$0xf0]  ;;  %v2932_v40 = vld [vmem:[#allocation10 + $0x38] sm:$0xff]  ;;  %v2927_v52 = vld [vmem:[#allocation10 + $0x10] sm:$0xff] }
  0xd2   :  { %v3282_v12 = vpack.c.bf16 %v525_v4, %v519_v60  ;;  %v2879_v60 = vld [vmem:[#allocation8 + $0x194] sm:$0xf]  ;;  %v2419_v16 = vor.u32 %v2897_v0, %v2416_v1  ;;  %v2940_v41 = vld [vmem:[#allocation10 + $0x78] sm:$0xff]  ;;  %v2934_v55 = vld [vmem:[#allocation10 + $0x48] sm:$0xff] }
  0xd3   :  { %1152 = vmatmul.bf16.vlgmr.msra.gmra.mxu0 %v3280_v6  ;;  %v2936_v51 = vld [vmem:[#allocation10 + $0x58] sm:$0xff]  ;;  %v2935_v53 = vld [vmem:[#allocation10 + $0x50] sm:$0xff]  ;;  %v2961_v0 = vld [vmem:[#allocation10 + $0x120] sm:$0xff] }
  0xd4   :  { %1166 = vmatmul.bf16.vlgmr.msra.gmra.mxu1 %v3282_v12  ;;  %1256 = vmatpush.bf16.msra.mxu0 %v2459_v5  ;;  %v2480_v5 = vld [vmem:[#allocation8 + $0x2a8] sm:$0xf0]  ;;  %v2969_v1 = vld [vmem:[#allocation10 + $0x160] sm:$0xff]  ;;  %v2944_v33 = vld [vmem:[#allocation10 + $0x98] sm:$0xff] }
  0xd5   :  { %1270 = vmatpush.bf16.msra.mxu1 %v2523_v7  ;;  %1230 = vmatpush.bf16.msrb.mxu2 %v2315_v11  ;;  %v2347_v7 = vor.u32 %v2879_v60, %v2344_v61  ;;  %v2483_v19 = vor.u32 %v2913_v2, %v2480_v5  ;;  %v2963_v60 = vld [vmem:[#allocation10 + $0x130] sm:$0xff]  ;;  %v2960_v2 = vld [vmem:[#allocation10 + $0x118] sm:$0xff] }
  0xd6   :  { %1244 = vmatpush.bf16.msrb.mxu3 %v2379_v14  ;;  %v2971_v61 = vld [vmem:[#allocation10 + $0x170] sm:$0xff] }
  0xd7   :  { %v2967_v5 = vld [vmem:[#allocation10 + $0x150] sm:$0xff] }
  0xd8   :  { %1257 = vmatpush.bf16.msra.mxu0 %v2451_v20  ;;  %v2895_v20 = vld [vmem:[#allocation8 + $0x214] sm:$0xf] }
  0xd9   :  { %1271 = vmatpush.bf16.msra.mxu1 %v2515_v21  ;;  %1231 = vmatpush.bf16.msrb.mxu2 %v2307_v25  ;;  %v2408_v21 = vld [vmem:[#allocation8 + $0x218] sm:$0xf0]  ;;  %v2911_v25 = vld [vmem:[#allocation8 + $0x294] sm:$0xf] }
  0xda   :  { %1245 = vmatpush.bf16.msrb.mxu3 %v2371_v27  ;;  %v2339_v27 = vor.u32 %v2877_v17, %v2336_v13  ;;  %v2411_v30 = vor.u32 %v2895_v20, %v2408_v21  ;;  %v2977_v17 = vld [vmem:[#allocation11 + $0x20] sm:$0xff]  ;;  %v2976_v13 = vld [vmem:[#allocation11 + $0x18] sm:$0xff]  ;;  %v2986_v20 = vld [vmem:[#allocation11 + $0x68] sm:$0xff] }
  0xdb   :  { %v2948_v21 = vld [vmem:[#allocation10 + $0xb8] sm:$0xff] }
  0xdc   :  { %v497_v42 = vpop.f32.mrf.mxu0  ;;  %1258 = vmatpush.bf16.msra.mxu0 %v2443_v31 }
  0xdd   :  { %v511_v47 = vpop.f32.mrf.mxu1  ;;  %1272 = vmatpush.bf16.msra.mxu1 %v2507_v32  ;;  %1232 = vmatpush.bf16.msrb.mxu2 %v2299_v36  ;;  %v498_v4 = vadd.f32 %v497_v42, %v178_v46  ;;  %v2475_v32 = vor.u32 %v2911_v25, %v2472_v26  ;;  %v2464_v36 = vld [vmem:[#allocation8 + $0x288] sm:$0xf0]  ;;  %v2931_v42 = vld [vmem:[#allocation10 + $0x30] sm:$0xff] }
  0xde   :  { %1246 = vmatpush.bf16.msrb.mxu3 %v2363_v39  ;;  %v512_v10 = vadd.f32 %v511_v47, %v179_v59  ;;  %v2467_v39 = vor.u32 %v2909_v35, %v2464_v36  ;;  %v2929_v47 = vld [vmem:[#allocation10 + $0x20] sm:$0xff]  ;;  %v2946_v26 = vld [vmem:[#allocation10 + $0xa8] sm:$0xff] }
  0xdf   :  { %v520_v23 = vmax.f32 %v498_v4, 0.0  ;;  %v2959_v4 = vld [vmem:[#allocation10 + $0x110] sm:$0xff]  ;;  %v2981_v36 = vld [vmem:[#allocation11 + $0x40] sm:$0xff] }
  0xe0   :  { %1259 = vmatpush.bf16.msra.mxu0 %v2435_v49  ;;  %v521_v38 = vmax.f32 %v512_v10, 0.0  ;;  %v2937_v49 = vld [vmem:[#allocation10 + $0x60] sm:$0xff]  ;;  %v2979_v10 = vld [vmem:[#allocation11 + $0x30] sm:$0xff] }
  0xe1   :  { %1273 = vmatpush.bf16.msra.mxu1 %v2499_v50  ;;  %1233 = vmatpush.bf16.msrb.mxu2 %v2291_v54  ;;  %v2928_v50 = vld [vmem:[#allocation10 + $0x18] sm:$0xff]  ;;  %v2926_v54 = vld [vmem:[#allocation10 + $0x8] sm:$0xff] }
  0xe2   :  { %1247 = vmatpush.bf16.msrb.mxu3 %v2355_v56  ;;  %v2925_v56 = vld [vmem:[#allocation10] sm:$0xff] }
  0xe3   :  { %1208 = vmatmul.bf16.vlgmr.msrb.gmra.mxu0 %v3274_v44 }
  0xe4   :  { %v499_v11 = vpop.f32.mrf.mxu0  ;;  %1222 = vmatmul.bf16.vlgmr.msrb.gmra.mxu1 %v3276_v48  ;;  %1260 = vmatpush.bf16.msra.mxu0 %v2427_v62  ;;  %v2962_v62 = vld [vmem:[#allocation10 + $0x128] sm:$0xff] }
  0xe5   :  { %v500_v14 = vadd.f32 %v499_v11, %v178_v46  ;;  %v513_v15 = vpop.f32.mrf.mxu1  ;;  %1274 = vmatpush.bf16.msra.mxu1 %v2491_v63  ;;  %1234 = vmatpush.bf16.msrb.mxu2 %v2283_v3  ;;  %v2938_v46 = vld [vmem:[#allocation10 + $0x68] sm:$0xff]  ;;  %v2968_v3 = vld [vmem:[#allocation10 + $0x158] sm:$0xff] }
  0xe6   :  { %v514_v18 = vadd.f32 %v513_v15, %v179_v59  ;;  %1248 = vmatpush.bf16.msrb.mxu3 %v2347_v7  ;;  %v2972_v59 = vld [vmem:[#allocation10 + $0x178] sm:$0xff]  ;;  %v2970_v63 = vld [vmem:[#allocation10 + $0x168] sm:$0xff]  ;;  %v2957_v7 = vld [vmem:[#allocation10 + $0x100] sm:$0xff] }
  0xe7   :  { %v526_v24 = vmax.f32 %v500_v14, 0.0  ;;  %v2978_v11 = vld [vmem:[#allocation11 + $0x28] sm:$0xff]  ;;  %v2988_v14 = vld [vmem:[#allocation11 + $0x78] sm:$0xff]  ;;  %v2975_v15 = vld [vmem:[#allocation11 + $0x10] sm:$0xff] }
  0xe8   :  { %v527_v28 = vmax.f32 %v514_v18, 0.0  ;;  %1261 = vmatpush.bf16.msra.mxu0 %v2419_v16  ;;  %v2974_v16 = vld [vmem:[#allocation11 + $0x8] sm:$0xff]  ;;  %v2987_v18 = vld [vmem:[#allocation11 + $0x70] sm:$0xff] }
  0xe9   :  { %v3290_v29 = vpack.c.bf16 %v526_v24, %v520_v23  ;;  %1275 = vmatpush.bf16.msra.mxu1 %v2483_v19  ;;  %1235 = vmatpush.bf16.msrb.mxu2 %v2275_v22  ;;  %v2973_v19 = vld [vmem:[#allocation11] sm:$0xff]  ;;  %v2947_v23 = vld [vmem:[#allocation10 + $0xb0] sm:$0xff]  ;;  %v2984_v24 = vld [vmem:[#allocation11 + $0x58] sm:$0xff] }
  0xea   :  { %v3292_v31 = vpack.c.bf16 %v527_v28, %v521_v38  ;;  %1249 = vmatpush.bf16.msrb.mxu3 %v2339_v27  ;;  %v2985_v22 = vld [vmem:[#allocation11 + $0x60] sm:$0xff]  ;;  %v2983_v38 = vld [vmem:[#allocation11 + $0x50] sm:$0xff] }
  0xeb   :  { %1180 = vmatmul.bf16.vlgmr.msra.gmra.mxu2 %v3290_v29 }
  0xec   :  { %1194 = vmatmul.bf16.vlgmr.msra.gmra.mxu3 %v3292_v31  ;;  %1262 = vmatpush.bf16.msra.mxu0 %v2411_v30 }
  0xed   :  { %1276 = vmatpush.bf16.msra.mxu1 %v2475_v32  ;;  %1514 = vmatpush.bf16.msra.mxu2 %v2980_v9  ;;  %v2982_v32 = vld [vmem:[#allocation11 + $0x48] sm:$0xff] }
  0xee   :  { %1528 = vmatpush.bf16.msra.mxu3 %v2988_v14  ;;  %v2950_v9 = vld [vmem:[#allocation10 + $0xc8] sm:$0xff] }
  0xf0   :  { %1263 = vmatpush.bf16.msra.mxu0 %v2403_v37 }
  0xf1   :  { %1277 = vmatpush.bf16.msra.mxu1 %v2467_v39  ;;  %1515 = vmatpush.bf16.msra.mxu2 %v2979_v10  ;;  %v2943_v39 = vld [vmem:[#allocation10 + $0x90] sm:$0xff] }
  0xf2   :  { %1529 = vmatpush.bf16.msra.mxu3 %v2987_v18 }
  0xf3   :  { %1264 = vmatmul.bf16.vlgmr.msra.gmra.mxu0 %v3290_v29 }
  0xf4   :  { %1830 = vmatpush.bf16.msrb.mxu0 %v2932_v40  ;;  %1278 = vmatmul.bf16.vlgmr.msra.gmra.mxu1 %v3292_v31  ;;  %v2956_v40 = vld [vmem:[#allocation10 + $0xf8] sm:$0xff] }
  0xf5   :  { %1844 = vmatpush.bf16.msrb.mxu1 %v2940_v41  ;;  %1516 = vmatpush.bf16.msra.mxu2 %v2978_v11 }
  0xf6   :  { %1530 = vmatpush.bf16.msra.mxu3 %v2986_v20 }
  0xf8   :  { %1831 = vmatpush.bf16.msrb.mxu0 %v2931_v42 }
  0xf9   :  { %1845 = vmatpush.bf16.msrb.mxu1 %v2939_v43  ;;  %1517 = vmatpush.bf16.msra.mxu2 %v2977_v17 }
  0xfa   :  { %1531 = vmatpush.bf16.msra.mxu3 %v2985_v22 }
  0xfb   :  { %1236 = vmatmul.bf16.vlgmr.msrb.gmra.mxu2 %v3280_v6 }
  0xfc   :  { %1832 = vmatpush.bf16.msrb.mxu0 %v2930_v45  ;;  %1250 = vmatmul.bf16.vlgmr.msrb.gmra.mxu3 %v3282_v12  ;;  %v2942_v45 = vld [vmem:[#allocation10 + $0x88] sm:$0xff] }
  0xfd   :  { %1846 = vmatpush.bf16.msrb.mxu1 %v2938_v46  ;;  %1518 = vmatpush.bf16.msra.mxu2 %v2976_v13  ;;  %v2955_v46 = vld [vmem:[#allocation10 + $0xf0] sm:$0xff] }
  0xfe   :  { %1532 = vmatpush.bf16.msra.mxu3 %v2984_v24 }
 0x100   :  { %1833 = vmatpush.bf16.msrb.mxu0 %v2929_v47 }
 0x101   :  { %1847 = vmatpush.bf16.msrb.mxu1 %v2937_v49  ;;  %1519 = vmatpush.bf16.msra.mxu2 %v2975_v15  ;;  %v2949_v15 = vld [vmem:[#allocation10 + $0xc0] sm:$0xff] }
 0x102   :  { %1533 = vmatpush.bf16.msra.mxu3 %v2983_v38 }
 0x104   :  { %1834 = vmatpush.bf16.msrb.mxu0 %v2928_v50 }
 0x105   :  { %1848 = vmatpush.bf16.msrb.mxu1 %v2936_v51  ;;  %1520 = vmatpush.bf16.msra.mxu2 %v2974_v16  ;;  %v2941_v51 = vld [vmem:[#allocation10 + $0x80] sm:$0xff] }
 0x106   :  { %1534 = vmatpush.bf16.msra.mxu3 %v2982_v32 }
 0x108   :  { %1835 = vmatpush.bf16.msrb.mxu0 %v2927_v52  ;;  %v2954_v52 = vld [vmem:[#allocation10 + $0xe8] sm:$0xff] }
 0x109   :  { %1849 = vmatpush.bf16.msrb.mxu1 %v2935_v53  ;;  %1521 = vmatpush.bf16.msra.mxu2 %v2973_v19 }
 0x10a   :  { %1535 = vmatpush.bf16.msra.mxu3 %v2981_v36 }
 0x10c   :  { %1836 = vmatpush.bf16.msrb.mxu0 %v2926_v54 }
 0x10d   :  { %1850 = vmatpush.bf16.msrb.mxu1 %v2934_v55  ;;  %1858 = vmatpush.bf16.msrb.mxu2 %v2948_v21 }
 0x10e   :  { %1872 = vmatpush.bf16.msrb.mxu3 %v2956_v40 }
 0x110   :  { %1837 = vmatpush.bf16.msrb.mxu0 %v2925_v56 }
 0x111   :  { %1851 = vmatpush.bf16.msrb.mxu1 %v2933_v57  ;;  %1859 = vmatpush.bf16.msrb.mxu2 %v2947_v23 }
 0x112   :  { %1873 = vmatpush.bf16.msrb.mxu3 %v2955_v46 }
 0x113   :  { %1838 = vmatmul.bf16.vlgmr.msrb.gmra.mxu0 %v3274_v44  ;;  %v2958_v44 = vld [vmem:[#allocation10 + $0x108] sm:$0xff] }
 0x114   :  { %1886 = vmatpush.bf16.msra.mxu0 %v2964_v58  ;;  %1852 = vmatmul.bf16.vlgmr.msrb.gmra.mxu1 %v3276_v48  ;;  %v2966_v48 = vld [vmem:[#allocation10 + $0x148] sm:$0xff]  ;;  %v2953_v58 = vld [vmem:[#allocation10 + $0xe0] sm:$0xff] }
 0x115   :  { %1900 = vmatpush.bf16.msra.mxu1 %v2972_v59  ;;  %1860 = vmatpush.bf16.msrb.mxu2 %v2946_v26 }
 0x116   :  { %1874 = vmatpush.bf16.msrb.mxu3 %v2954_v52 }
 0x118   :  { %1887 = vmatpush.bf16.msra.mxu0 %v2963_v60 }
 0x119   :  { %1901 = vmatpush.bf16.msra.mxu1 %v2971_v61 }
 0x11a   :  { %1875 = vmatpush.bf16.msrb.mxu3 %v2953_v58 }
 0x11c   :  { %1888 = vmatpush.bf16.msra.mxu0 %v2962_v62  ;;  %v2952_v62 = vld [vmem:[#allocation10 + $0xd8] sm:$0xff] }
 0x11d   :  { %1902 = vmatpush.bf16.msra.mxu1 %v2970_v63 }
 0x11e   :  { %1876 = vmatpush.bf16.msrb.mxu3 %v2952_v62 }
 0x120   :  { %1889 = vmatpush.bf16.msra.mxu0 %v2961_v0 }
 0x121   :  { %1903 = vmatpush.bf16.msra.mxu1 %v2969_v1 }
 0x124   :  { %1890 = vmatpush.bf16.msra.mxu0 %v2960_v2 }
 0x125   :  { %1904 = vmatpush.bf16.msra.mxu1 %v2968_v3 }
 0x128   :  { %1891 = vmatpush.bf16.msra.mxu0 %v2959_v4 }
 0x129   :  { %1905 = vmatpush.bf16.msra.mxu1 %v2967_v5 }
 0x12c   :  { %1892 = vmatpush.bf16.msra.mxu0 %v2958_v44  ;;  %v2951_v44 = vld [vmem:[#allocation10 + $0xd0] sm:$0xff] }
 0x12d   :  { %1906 = vmatpush.bf16.msra.mxu1 %v2966_v48  ;;  %1877 = vmatpush.bf16.msrb.mxu3 %v2951_v44 }
 0x130   :  { %1893 = vmatpush.bf16.msra.mxu0 %v2957_v7 }
 0x131   :  { %1907 = vmatpush.bf16.msra.mxu1 %v2965_v8  ;;  %1878 = vmatpush.bf16.msrb.mxu3 %v2950_v9 }
 0x133   :  { %1894 = vmatmul.bf16.vlgmr.msra.gmra.mxu0 %v3290_v29  ;;  %v2945_v29 = vld [vmem:[#allocation10 + $0xa0] sm:$0xff] }
 0x134   :  { %1908 = vmatmul.bf16.vlgmr.msra.gmra.mxu1 %v3292_v31  ;;  %v3307_v31 = vld [vmem:[%s3326_s4] sm:$0x3]  ;;  %1861 = vmatpush.bf16.msrb.mxu2 %v2945_v29 }
 0x135   :  { %v632_v34 = vperm.slane %v3307_v31, 0  ;;  %v633_v0 = vperm.slane %v3307_v31, 1  ;;  %1879 = vmatpush.bf16.msrb.mxu3 %v2949_v15 }
 0x138   :  { %1862 = vmatpush.bf16.msrb.mxu2 %v2944_v33 }
 0x13c   :  { %1863 = vmatpush.bf16.msrb.mxu2 %v2943_v39 }
 0x140   :  { %1864 = vmatpush.bf16.msrb.mxu2 %v2942_v45 }
 0x144   :  { %1865 = vmatpush.bf16.msrb.mxu2 %v2941_v51 }
 0x14e   :  { %v1125_v28 = vpop.f32.mrf.mxu2 }
 0x14f   :  { %v1139_v30 = vpop.f32.mrf.mxu3  ;;  %v1126_v41 = vadd.f32 %v1125_v28, %v632_v34 }
 0x150   :  { %v1153_v25 = vpop.f32.mrf.mxu0 }
 0x151   :  { %v1167_v27 = vpop.f32.mrf.mxu1  ;;  %v1140_v47 = vadd.f32 %v1139_v30, %v1126_v41 }
 0x153   :  { %v1154_v53 = vadd.f32 %v1153_v25, %v1140_v47 }
 0x155   :  { %v1168_v59 = vadd.f32 %v1167_v27, %v1154_v53 }
 0x156   :  { %v1127_v42 = vpop.f32.mrf.mxu2 }
 0x157   :  { %v1141_v43 = vpop.f32.mrf.mxu3  ;;  %v1128_v49 = vadd.f32 %v1127_v42, %v632_v34 }
 0x158   :  { %v1155_v35 = vpop.f32.mrf.mxu0 }
 0x159   :  { %v1169_v37 = vpop.f32.mrf.mxu1  ;;  %v1142_v54 = vadd.f32 %v1141_v43, %v1128_v49 }
 0x15b   :  { %v1156_v60 = vadd.f32 %v1155_v35, %v1142_v54 }
 0x15d   :  { %v1170_v63 = vadd.f32 %v1169_v37, %v1156_v60 }
 0x160   :  { %v1209_v50 = vpop.f32.mrf.mxu0 }
 0x161   :  { %v1223_v55 = vpop.f32.mrf.mxu1  ;;  %v1210_v7 = vadd.f32 %v1209_v50, %v633_v0 }
 0x163   :  { %v1224_v17 = vadd.f32 %v1223_v55, %v1210_v7 }
 0x168   :  { %v1211_v1 = vpop.f32.mrf.mxu0 }
 0x169   :  { %v1225_v48 = vpop.f32.mrf.mxu1  ;;  %v1212_v20 = vadd.f32 %v1211_v1, %v633_v0 }
 0x16b   :  { %v1226_v23 = vadd.f32 %v1225_v48, %v1212_v20 }
 0x16e   :  { %v1181_v56 = vpop.f32.mrf.mxu2 }
 0x16f   :  { %v1195_v57 = vpop.f32.mrf.mxu3  ;;  %v1182_v61 = vadd.f32 %v1181_v56, %v1168_v59 }
 0x170   :  { %v1265_v19 = vpop.f32.mrf.mxu0 }
 0x171   :  { %v1196_v3 = vadd.f32 %v1195_v57, %v1182_v61  ;;  %v1279_v21 = vpop.f32.mrf.mxu1  ;;  %v3002_v57 = vld [vmem:[%s3329_s7] ss:$0 sm:$0xff] }
 0x173   :  { %v1284_v10 = vmax.f32 %v1196_v3, 0.0 }
 0x176   :  { %v1183_v2 = vpop.f32.mrf.mxu2 }
 0x177   :  { %v1184_v4 = vadd.f32 %v1183_v2, %v1170_v63  ;;  %v1197_v5 = vpop.f32.mrf.mxu3 }
 0x178   :  { %v1267_v28 = vpop.f32.mrf.mxu0 }
 0x179   :  { %v1198_v8 = vadd.f32 %v1197_v5, %v1184_v4  ;;  %v1281_v31 = vpop.f32.mrf.mxu1 }
 0x17b   :  { %v1286_v11 = vmax.f32 %v1198_v8, 0.0 }
 0x17d   :  { %v1288_v13 = vpack.c.bf16 %v1286_v11, %v1284_v10 }
 0x17e   :  { %v1237_v14 = vpop.f32.mrf.mxu2 }
 0x17f   :  { %v1238_v16 = vadd.f32 %v1237_v14, %v1224_v17  ;;  %v1251_v18 = vpop.f32.mrf.mxu3  ;;  %1522 = vmatmul.bf16.vlgmr.msra.gmra.mxu2 %v1288_v13 }
 0x181   :  { %v1252_v22 = vadd.f32 %v1251_v18, %v1238_v16 }
 0x183   :  { %v1266_v25 = vadd.f32 %v1265_v19, %v1252_v22 }
 0x185   :  { %v1280_v29 = vadd.f32 %v1279_v21, %v1266_v25 }
 0x186   :  { %v1239_v24 = vpop.f32.mrf.mxu2 }
 0x187   :  { %v1240_v26 = vadd.f32 %v1239_v24, %v1226_v23  ;;  %v1253_v27 = vpop.f32.mrf.mxu3  ;;  %v1285_v33 = vmax.f32 %v1280_v29, 0.0 }
 0x189   :  { %v1254_v38 = vadd.f32 %v1253_v27, %v1240_v26 }
 0x18b   :  { %v1268_v30 = vadd.f32 %v1267_v28, %v1254_v38 }
 0x18d   :  { %v1282_v32 = vadd.f32 %v1281_v31, %v1268_v30 }
 0x18f   :  { %v1287_v34 = vmax.f32 %v1282_v32, 0.0  ;;  %1866 = vmatmul.bf16.vlgmr.msrb.gmra.mxu2 %v3280_v6 }
 0x190   :  { %v1839_v37 = vpop.f32.mrf.mxu0 }
 0x191   :  { %v1289_v35 = vpack.c.bf16 %v1287_v34, %v1285_v33  ;;  %v1853_v39 = vpop.f32.mrf.mxu1 }
 0x193   :  { %1536 = vmatmul.bf16.vlgmr.msra.gmra.mxu3 %v1289_v35 }
 0x198   :  { %v1841_v45 = vpop.f32.mrf.mxu0 }
 0x199   :  { %v1855_v47 = vpop.f32.mrf.mxu1 }
 0x1a3   :  { %1880 = vmatmul.bf16.vlgmr.msrb.gmra.mxu3 %v3282_v12 }
 0x1b0   :  { %v1895_v6 = vpop.f32.mrf.mxu0 }
 0x1b1   :  { %v1909_v56 = vpop.f32.mrf.mxu1 }
 0x1b8   :  { %v1897_v1 = vpop.f32.mrf.mxu0 }
 0x1b9   :  { %v1911_v3 = vpop.f32.mrf.mxu1 }
 0x202   :  { %v1523_v36 = vpop.f32.mrf.mxu2 }
 0x20a   :  { %v1525_v41 = vpop.f32.mrf.mxu2 }
 0x212   :  { %v1867_v51 = vpop.f32.mrf.mxu2 }
 0x216   :  { %v1537_v40 = vpop.f32.mrf.mxu3 }
 0x217   :  { %v1538_v42 = vadd.f32 %v1537_v40, %v1523_v36 }
 0x219   :  { %v1840_v43 = vadd.f32 %v1839_v37, %v1538_v42 }
 0x21a   :  { %v1869_v60 = vpop.f32.mrf.mxu2 }
 0x21b   :  { %v1854_v50 = vadd.f32 %v1853_v39, %v1840_v43 }
 0x21d   :  { %v1868_v53 = vadd.f32 %v1867_v51, %v1854_v50 }
 0x21e   :  { %v1539_v46 = vpop.f32.mrf.mxu3 }
 0x21f   :  { %v1540_v49 = vadd.f32 %v1539_v46, %v1525_v41 }
 0x221   :  { %v1842_v52 = vadd.f32 %v1841_v45, %v1540_v49 }
 0x223   :  { %v1856_v58 = vadd.f32 %v1855_v47, %v1842_v52 }
 0x225   :  { %v1870_v62 = vadd.f32 %v1869_v60, %v1856_v58 }
 0x226   :  { %v1881_v54 = vpop.f32.mrf.mxu3 }
 0x227   :  { %v1882_v55 = vadd.f32 %v1881_v54, %v1868_v53 }
 0x229   :  { %v1896_v12 = vadd.f32 %v1895_v6, %v1882_v55 }
 0x22b   :  { %v1910_v59 = vadd.f32 %v1909_v56, %v1896_v12 }
 0x22d   :  { %v1918_v61 = vadd.f32 %v3002_v57, %v1910_v59 }
 0x22e   :  { %v1883_v63 = vpop.f32.mrf.mxu3 }
 0x22f   :  { %1920 = vst [vmem:[#allocation13] sm:$0xff] %v1918_v61  ;;  %v1884_v0 = vadd.f32 %v1883_v63, %v1870_v62 }
 0x231   :  { %v1898_v2 = vadd.f32 %v1897_v1, %v1884_v0 }
 0x233   :  { %v1912_v4 = vadd.f32 %v1911_v3, %v1898_v2 }
 0x235   :  { %v1919_v5 = vadd.f32 %v3002_v57, %v1912_v4 }
 0x237   :  { %1921 = vst [vmem:[#allocation13 + $0x8] sm:$0xff] %v1919_v5 }
 0x238   :  { %1934 = dma.vmem_to_hbm [thread:$0]  %s1927_s1, 256, %s1929_s21, [#allocation4], %s3185_s17, %s3185_s17, %s3186_s18  }
 0x239   :  { %3179 = dma.done.wait [#allocation4], 256  }
 0x23a   :  { %3180 = vsyncadd [#allocation4], 4294967040 }
 0x23b   :  { %1939 = vsyncpa [#allocation3], 1 }
 0x23c   :  { %1940 = vsyncpa [#allocation6], 1 }
 0x23d   :  { %1941 = vsyncpa [#allocation9], 1 }
 0x23e   :  { %1942 = vsyncpa [#allocation12], 1 }
 0x23f   :  { %1943 = vsyncpa [#allocation4], 1 }

</bundles_post_ra>
